<compile_context>
chip_gen: v5e
topology: v5e:2x2
jax: 0.10.0
libtpu: 0.0.40
codegen_flags: <defaults>
</compile_context>

<pallas_src>
import functools
import math

import jax
import jax.numpy as jnp
from jax.experimental import pallas as pl
from jax.experimental.pallas import tpu as pltpu


# -----------------------------------------------------------------------------
# Kernel: one (batch row, q-tile, head) step
# -----------------------------------------------------------------------------
def _mha_head_kernel(q_ref, k_ref, v_ref, m_ref,
                     wq_ref, wk_ref, wv_ref, wfc_ref, bfc_ref,
                     out_ref, sim_ref):
    # q_ref : (1, tq, E) bf16        k_ref/v_ref : (1, S, E) bf16
    # m_ref : (1, tq, S) bf16 additive mask
    # wq/wk/wv_ref : (1, E, D) bf16  (pre-transposed per head; 1/D folded into Wq)
    # wfc_ref : (1, D, E) bf16       bfc_ref : (1, E) f32
    # out_ref : (1, tq, E) f32  -- resident accumulator across the head axis
    # sim_ref : (1, tq, S) f32  -- this head's block of the (B, S, H*S) concat
    h = pl.program_id(2)

    x_q = q_ref[0]
    x_k = k_ref[0]
    x_v = v_ref[0]

    # Per-head projections: bf16 MXU operands, f32 accumulation.
    q = jnp.dot(x_q, wq_ref[0], preferred_element_type=jnp.float32)   # (tq, D), pre-scaled by 1/D
    k = jnp.dot(x_k, wk_ref[0], preferred_element_type=jnp.float32)   # (S, D)
    v = jnp.dot(x_v, wv_ref[0], preferred_element_type=jnp.float32)   # (S, D)

    # Logits: q @ k^T (contract last dims -> no transpose relayout), + mask.
    s = jax.lax.dot_general(q.astype(jnp.bfloat16), k.astype(jnp.bfloat16),
                            (((1,), (1,)), ((), ())),
                            preferred_element_type=jnp.float32)       # (tq, S)
    s = s + m_ref[0].astype(jnp.float32)

    # Numerically stable softmax, kept in f32.
    s = s - jnp.max(s, axis=-1, keepdims=True)
    p = jnp.exp(s)
    inv_l = pl.reciprocal(jnp.sum(p, axis=-1, keepdims=True), approx=True)  # EUP slot
    sim_h = p * inv_l                                                  # (tq, S) f32

    # Streamed store of this head's slice of the torch.cat(..., dim=-1) layout.
    sim_ref[...] = sim_h.reshape(sim_ref.shape)

    # score_h = sim_h @ v  (bf16 operands, f32 accumulation).
    score_h = jnp.dot(sim_h.astype(jnp.bfloat16), v.astype(jnp.bfloat16),
                      preferred_element_type=jnp.float32)              # (tq, D)

    # Streamed fc epilogue: out = relu(sum_h score_h @ Wfc_h^T + b).
    partial = jnp.dot(score_h.astype(jnp.bfloat16), wfc_ref[0],
                      preferred_element_type=jnp.float32)              # (tq, E)

    @pl.when(h == 0)
    def _():
        out_ref[0] = partial + bfc_ref[...]          # (1,E) bias broadcasts over tq

    @pl.when(h != 0)
    def _():
        out_ref[0] = out_ref[0] + partial

    @pl.when(h == pl.num_programs(2) - 1)
    def _():
        out_ref[0] = jnp.maximum(out_ref[0], 0.0)


# -----------------------------------------------------------------------------
# Wrapper
# -----------------------------------------------------------------------------
def _vmem_limit_bytes():
    try:
        cap = pltpu.get_tpu_info().vmem_capacity_bytes
    except Exception:
        cap = 64 * 1024 * 1024
    # Budget ~75% of physical VMEM, never more than 96 MiB.
    return int(min(cap * 3 // 4, 96 * 1024 * 1024))


@functools.partial(jax.jit, static_argnames=("num_heads",))
def multi_head_attention(query, key, value, mask,
                         wq, wk, wv, w_fc, b_fc, *, num_heads):
    """query/key/value: (B,S,E) f32; mask: (B,S,S) additive or None;
    wq/wk/wv: (H, D, E) (PyTorch Linear (out,in), one per head);
    w_fc: (E, E); b_fc: (E,). Returns (out (B,S,E), sim (B,S,H*S))."""
    B, S, E = query.shape
    H = num_heads
    D = E // H
    assert D * H == E, "embed_dim must be divisible by num_heads"

    if mask is None:
        # TODO(synk): synthesize common (causal/padding) masks in-kernel from iota.
        mask = jnp.zeros((B, S, S), jnp.float32)

    # q-row tile: full S for short sequences, otherwise a 128-aligned divisor.
    if S <= 512:
        tq = S
    else:
        tq = next((t for t in (512, 256, 128) if S % t == 0), S)
    nq = S // tq

    # One-time wrapper-side weight prep: fold 1/D into Wq, pre-transpose each
    # head to (E, D), stack fc weight per head as (H, D, E), cast to bf16.
    wq_t = jnp.transpose(wq * (1.0 / D), (0, 2, 1)).astype(jnp.bfloat16)   # (H, E, D)
    wk_t = jnp.transpose(wk, (0, 2, 1)).astype(jnp.bfloat16)               # (H, E, D)
    wv_t = jnp.transpose(wv, (0, 2, 1)).astype(jnp.bfloat16)               # (H, E, D)
    wfc_t = jnp.transpose(w_fc, (1, 0)).reshape(H, D, E).astype(jnp.bfloat16)  # (H, D, E)
    bfc = b_fc.reshape(1, E).astype(jnp.float32)

    q_bf = query.astype(jnp.bfloat16)
    k_bf = key.astype(jnp.bfloat16)
    v_bf = value.astype(jnp.bfloat16)
    m_bf = mask.astype(jnp.bfloat16)     # 0 / large-negative representable exactly enough

    # sim in final concat layout when the per-head S block is lane-aligned;
    # otherwise emit (B,H,S,S) and re-concatenate outside the kernel.
    sim_aligned = (H == 1) or (S % 128 == 0)
    if sim_aligned:
        sim_shape = jax.ShapeDtypeStruct((B, S, H * S), jnp.float32)
        sim_spec = pl.BlockSpec((1, tq, S), lambda b, qi, h: (b, qi, h))
    else:
        sim_shape = jax.ShapeDtypeStruct((B, H, S, S), jnp.float32)
        sim_spec = pl.BlockSpec((1, 1, tq, S), lambda b, qi, h: (b, h, qi, 0))

    out, sim = pl.pallas_call(
        _mha_head_kernel,
        out_shape=(
            jax.ShapeDtypeStruct((B, S, E), jnp.float32),
            sim_shape,
        ),
        grid_spec=pltpu.PrefetchScalarGridSpec(
            num_scalar_prefetch=0,
            grid=(B, nq, H),
            in_specs=[
                pl.BlockSpec((1, tq, E), lambda b, qi, h: (b, qi, 0)),   # query (resident over h)
                pl.BlockSpec((1, S, E), lambda b, qi, h: (b, 0, 0)),     # key   (resident over qi,h)
                pl.BlockSpec((1, S, E), lambda b, qi, h: (b, 0, 0)),     # value (resident over qi,h)
                pl.BlockSpec((1, tq, S), lambda b, qi, h: (b, qi, 0)),   # mask  (resident over h)
                pl.BlockSpec((1, E, D), lambda b, qi, h: (h, 0, 0)),     # Wq_h^T (pre-scaled)
                pl.BlockSpec((1, E, D), lambda b, qi, h: (h, 0, 0)),     # Wk_h^T
                pl.BlockSpec((1, E, D), lambda b, qi, h: (h, 0, 0)),     # Wv_h^T
                pl.BlockSpec((1, D, E), lambda b, qi, h: (h, 0, 0)),     # Wfc_h^T
                pl.BlockSpec((1, E), lambda b, qi, h: (0, 0)),           # b_fc
            ],
            out_specs=[
                pl.BlockSpec((1, tq, E), lambda b, qi, h: (b, qi, 0)),   # out (accumulated over h)
                sim_spec,                                                # sim (streamed per head)
            ],
        ),
        compiler_params=pltpu.CompilerParams(
            dimension_semantics=("parallel", "parallel", "arbitrary"),
            vmem_limit_bytes=_vmem_limit_bytes()),
    )(q_bf, k_bf, v_bf, m_bf, wq_t, wk_t, wv_t, wfc_t, bfc)

    if not sim_aligned:
        sim = jnp.transpose(sim, (0, 2, 1, 3)).reshape(B, S, H * S)

    return out, sim


# -----------------------------------------------------------------------------
# Pure-JAX reference (f32 throughout) for correctness check
# -----------------------------------------------------------------------------
def _reference(query, key, value, mask, wq, wk, wv, w_fc, b_fc, num_heads):
    B, S, E = query.shape
    D = E // num_heads
    scores, sims = [], []
    for h in range(num_heads):
        q = query @ wq[h].T
        k = key @ wk[h].T
        v = value @ wv[h].T
        s = (q @ jnp.swapaxes(k, -2, -1)) / D + mask
        sim = jax.nn.softmax(s, axis=-1)
        scores.append(sim @ v)
        sims.append(sim)
    score = jnp.concatenate(scores, axis=-1)
    sim = jnp.concatenate(sims, axis=-1)
    out = jnp.maximum(score @ w_fc.T + b_fc, 0.0)
    return out, sim


if __name__ == "__main__":
    # Small but lane-aligned shapes (last dims multiples of 128 keep every
    # BlockSpec on the (8,128) grid).
    B, S, E, H = 2, 128, 128, 4
    D = E // H

    key0 = jax.random.PRNGKey(0)
    ks = jax.random.split(key0, 10)

    query = jax.random.normal(ks[0], (B, S, E), jnp.float32)
    key_t = jax.random.normal(ks[1], (B, S, E), jnp.float32)
    value = jax.random.normal(ks[2], (B, S, E), jnp.float32)

    # Additive causal mask (0 keep / -1e9 mask).
    row = jnp.arange(S)[:, None]
    col = jnp.arange(S)[None, :]
    causal = jnp.where(row >= col, 0.0, -1e9).astype(jnp.float32)
    mask = jnp.tile(causal[None], (B, 1, 1))

    # Deterministic parameter init (PyTorch Linear (out, in) convention).
    bound = 1.0 / math.sqrt(E)
    wq = jax.random.uniform(ks[3], (H, D, E), jnp.float32, -bound, bound)
    wk = jax.random.uniform(ks[4], (H, D, E), jnp.float32, -bound, bound)
    wv = jax.random.uniform(ks[5], (H, D, E), jnp.float32, -bound, bound)
    w_fc = jax.random.uniform(ks[6], (E, E), jnp.float32, -bound, bound)
    b_fc = jax.random.uniform(ks[7], (E,), jnp.float32, -bound, bound)

    out, sim = multi_head_attention(query, key_t, value, mask,
                                    wq, wk, wv, w_fc, b_fc, num_heads=H)
    jax.block_until_ready((out, sim))

    ref_out, ref_sim = _reference(query, key_t, value, mask,
                                  wq, wk, wv, w_fc, b_fc, H)

    assert out.shape == (B, S, E) and sim.shape == (B, S, H * S)
    assert bool(jnp.all(jnp.isfinite(out))) and bool(jnp.all(jnp.isfinite(sim)))
    # bf16 MXU operands + approx reciprocal -> compare at bf16-level tolerance.
    assert jnp.allclose(sim, ref_sim, atol=2e-2, rtol=2e-2)
    assert jnp.allclose(out, ref_out, atol=2e-2, rtol=2e-2)

    print("KERNEL_OK")
</pallas_src>

<mosaic_0001>
module attributes {stable_mosaic.version = 11 : i64} {
  func.func @_mha_head_kernel(%arg0: i32, %arg1: i32, %arg2: i32, %arg3: memref<1x128x128xbf16, #tpu.memory_space<vmem>>, %arg4: memref<1x128x128xbf16, #tpu.memory_space<vmem>>, %arg5: memref<1x128x128xbf16, #tpu.memory_space<vmem>>, %arg6: memref<1x128x128xbf16, #tpu.memory_space<vmem>>, %arg7: memref<1x128x32xbf16, #tpu.memory_space<vmem>>, %arg8: memref<1x128x32xbf16, #tpu.memory_space<vmem>>, %arg9: memref<1x128x32xbf16, #tpu.memory_space<vmem>>, %arg10: memref<1x32x128xbf16, #tpu.memory_space<vmem>>, %arg11: memref<1x128xf32, #tpu.memory_space<vmem>>, %arg12: memref<1x128x128xf32, #tpu.memory_space<vmem>>, %arg13: memref<1x128x128xf32, #tpu.memory_space<vmem>>) attributes {dimension_semantics = [#tpu.dimension_semantics<parallel>, #tpu.dimension_semantics<parallel>, #tpu.dimension_semantics<arbitrary>], iteration_bounds = array<i64: 2, 1, 4>, scalar_prefetch = 0 : i64, scratch_operands = 0 : i64, tpu.core_type = #tpu.core_type<tc>, window_params = [{transform_indices = @transform_0, window_bounds = array<i64: 1, 128, 128>}, {transform_indices = @transform_1, window_bounds = array<i64: 1, 128, 128>}, {transform_indices = @transform_2, window_bounds = array<i64: 1, 128, 128>}, {transform_indices = @transform_3, window_bounds = array<i64: 1, 128, 128>}, {transform_indices = @transform_4, window_bounds = array<i64: 1, 128, 32>}, {transform_indices = @transform_5, window_bounds = array<i64: 1, 128, 32>}, {transform_indices = @transform_6, window_bounds = array<i64: 1, 128, 32>}, {transform_indices = @transform_7, window_bounds = array<i64: 1, 32, 128>}, {pipeline_mode = #tpu.pipeline_mode<synchronous>, transform_indices = @transform_8, window_bounds = array<i64: 1, 128>}, {transform_indices = @transform_9, window_bounds = array<i64: 1, 128, 128>}, {transform_indices = @transform_10, window_bounds = array<i64: 1, 128, 128>}]} {
    %c0 = arith.constant 0 : index
    %c0_0 = arith.constant 0 : index
    %c0_1 = arith.constant 0 : index
    %0 = vector.load %arg3[%c0, %c0_0, %c0_1] : memref<1x128x128xbf16, #tpu.memory_space<vmem>>, vector<1x128x128xbf16>
    %1 = vector.shape_cast %0 : vector<1x128x128xbf16> to vector<128x128xbf16>
    %c0_2 = arith.constant 0 : index
    %c0_3 = arith.constant 0 : index
    %c0_4 = arith.constant 0 : index
    %2 = vector.load %arg4[%c0_2, %c0_3, %c0_4] : memref<1x128x128xbf16, #tpu.memory_space<vmem>>, vector<1x128x128xbf16>
    %3 = vector.shape_cast %2 : vector<1x128x128xbf16> to vector<128x128xbf16>
    %c0_5 = arith.constant 0 : index
    %c0_6 = arith.constant 0 : index
    %c0_7 = arith.constant 0 : index
    %4 = vector.load %arg5[%c0_5, %c0_6, %c0_7] : memref<1x128x128xbf16, #tpu.memory_space<vmem>>, vector<1x128x128xbf16>
    %5 = vector.shape_cast %4 : vector<1x128x128xbf16> to vector<128x128xbf16>
    %c0_8 = arith.constant 0 : index
    %c0_9 = arith.constant 0 : index
    %c0_10 = arith.constant 0 : index
    %6 = vector.load %arg7[%c0_8, %c0_9, %c0_10] : memref<1x128x32xbf16, #tpu.memory_space<vmem>>, vector<1x128x32xbf16>
    %7 = vector.shape_cast %6 : vector<1x128x32xbf16> to vector<128x32xbf16>
    %cst = arith.constant dense<0.000000e+00> : vector<128x32xf32>
    %8 = tpu.matmul %1, %7, %cst {dimension_numbers = #tpu.dot_dimension_numbers<[1], [0], [0], [1], [0, 0, 1, 1], [], []>} : vector<128x128xbf16>, vector<128x32xbf16>, vector<128x32xf32> -> vector<128x32xf32>
    %c0_11 = arith.constant 0 : index
    %c0_12 = arith.constant 0 : index
    %c0_13 = arith.constant 0 : index
    %9 = vector.load %arg8[%c0_11, %c0_12, %c0_13] : memref<1x128x32xbf16, #tpu.memory_space<vmem>>, vector<1x128x32xbf16>
    %10 = vector.shape_cast %9 : vector<1x128x32xbf16> to vector<128x32xbf16>
    %cst_14 = arith.constant dense<0.000000e+00> : vector<128x32xf32>
    %11 = tpu.matmul %3, %10, %cst_14 {dimension_numbers = #tpu.dot_dimension_numbers<[1], [0], [0], [1], [0, 0, 1, 1], [], []>} : vector<128x128xbf16>, vector<128x32xbf16>, vector<128x32xf32> -> vector<128x32xf32>
    %c0_15 = arith.constant 0 : index
    %c0_16 = arith.constant 0 : index
    %c0_17 = arith.constant 0 : index
    %12 = vector.load %arg9[%c0_15, %c0_16, %c0_17] : memref<1x128x32xbf16, #tpu.memory_space<vmem>>, vector<1x128x32xbf16>
    %13 = vector.shape_cast %12 : vector<1x128x32xbf16> to vector<128x32xbf16>
    %cst_18 = arith.constant dense<0.000000e+00> : vector<128x32xf32>
    %14 = tpu.matmul %5, %13, %cst_18 {dimension_numbers = #tpu.dot_dimension_numbers<[1], [0], [0], [1], [0, 0, 1, 1], [], []>} : vector<128x128xbf16>, vector<128x32xbf16>, vector<128x32xf32> -> vector<128x32xf32>
    %15 = arith.truncf %8 : vector<128x32xf32> to vector<128x32xbf16>
    %16 = arith.truncf %11 : vector<128x32xf32> to vector<128x32xbf16>
    %cst_19 = arith.constant dense<0.000000e+00> : vector<128x128xf32>
    %17 = tpu.matmul %15, %16, %cst_19 {dimension_numbers = #tpu.dot_dimension_numbers<[1], [1], [0], [0], [0, 0, 1, 0], [], []>} : vector<128x32xbf16>, vector<128x32xbf16>, vector<128x128xf32> -> vector<128x128xf32>
    %c0_20 = arith.constant 0 : index
    %c0_21 = arith.constant 0 : index
    %c0_22 = arith.constant 0 : index
    %18 = vector.load %arg6[%c0_20, %c0_21, %c0_22] : memref<1x128x128xbf16, #tpu.memory_space<vmem>>, vector<1x128x128xbf16>
    %19 = vector.shape_cast %18 : vector<1x128x128xbf16> to vector<128x128xbf16>
    %20 = arith.extf %19 : vector<128x128xbf16> to vector<128x128xf32>
    %21 = arith.addf %17, %20 : vector<128x128xf32>
    %cst_23 = arith.constant dense<0xFF800000> : vector<128xf32>
    %22 = vector.multi_reduction <maximumf>, %21, %cst_23 [1] : vector<128x128xf32> to vector<128xf32>
    %23 = vector.shape_cast %22 : vector<128xf32> to vector<128x1xf32>
    %24 = vector.broadcast %23 : vector<128x1xf32> to vector<128x128xf32>
    %25 = arith.subf %21, %24 : vector<128x128xf32>
    %26 = math.exp %25 : vector<128x128xf32>
    %cst_24 = arith.constant dense<0.000000e+00> : vector<128xf32>
    %27 = vector.multi_reduction <add>, %26, %cst_24 [1] : vector<128x128xf32> to vector<128xf32>
    %28 = vector.shape_cast %27 : vector<128xf32> to vector<128x1xf32>
    %29 = tpu.reciprocal %28 {approx = true} : vector<128x1xf32> -> vector<128x1xf32>
    %30 = vector.broadcast %29 : vector<128x1xf32> to vector<128x128xf32>
    %31 = arith.mulf %26, %30 : vector<128x128xf32>
    %32 = vector.shape_cast %31 : vector<128x128xf32> to vector<1x128x128xf32>
    %c0_25 = arith.constant 0 : index
    %c0_26 = arith.constant 0 : index
    %c0_27 = arith.constant 0 : index
    %33 = vector.load %arg13[%c0_25, %c0_26, %c0_27] : memref<1x128x128xf32, #tpu.memory_space<vmem>>, vector<1x128x128xf32>
    tpu.vector_store %arg13[%c0_25, %c0_26, %c0_27], %32 {strides = array<i32>} : memref<1x128x128xf32, #tpu.memory_space<vmem>>, vector<1x128x128xf32>,
    %34 = arith.truncf %31 : vector<128x128xf32> to vector<128x128xbf16>
    %35 = arith.truncf %14 : vector<128x32xf32> to vector<128x32xbf16>
    %cst_28 = arith.constant dense<0.000000e+00> : vector<128x32xf32>
    %36 = tpu.matmul %34, %35, %cst_28 {dimension_numbers = #tpu.dot_dimension_numbers<[1], [0], [0], [1], [0, 0, 1, 1], [], []>} : vector<128x128xbf16>, vector<128x32xbf16>, vector<128x32xf32> -> vector<128x32xf32>
    %37 = arith.truncf %36 : vector<128x32xf32> to vector<128x32xbf16>
    %c0_29 = arith.constant 0 : index
    %c0_30 = arith.constant 0 : index
    %c0_31 = arith.constant 0 : index
    %38 = vector.load %arg10[%c0_29, %c0_30, %c0_31] : memref<1x32x128xbf16, #tpu.memory_space<vmem>>, vector<1x32x128xbf16>
    %39 = vector.shape_cast %38 : vector<1x32x128xbf16> to vector<32x128xbf16>
    %cst_32 = arith.constant dense<0.000000e+00> : vector<128x128xf32>
    %40 = tpu.matmul %37, %39, %cst_32 {dimension_numbers = #tpu.dot_dimension_numbers<[1], [0], [0], [1], [0, 0, 1, 1], [], []>} : vector<128x32xbf16>, vector<32x128xbf16>, vector<128x128xf32> -> vector<128x128xf32>
    %c0_i32 = arith.constant 0 : i32
    %41 = arith.cmpi eq, %arg2, %c0_i32 : i32
    %42 = arith.extui %41 : i1 to i32
    %c0_i32_33 = arith.constant 0 : i32
    %43 = arith.cmpi ne, %42, %c0_i32_33 : i32
    scf.if %43 {
      %c0_37 = arith.constant 0 : index
      %c0_38 = arith.constant 0 : index
      %50 = vector.load %arg11[%c0_37, %c0_38] : memref<1x128xf32, #tpu.memory_space<vmem>>, vector<1x128xf32>
      %51 = vector.broadcast %50 : vector<1x128xf32> to vector<128x128xf32>
      %52 = arith.addf %40, %51 : vector<128x128xf32>
      %c0_39 = arith.constant 0 : index
      %c0_40 = arith.constant 0 : index
      %c0_41 = arith.constant 0 : index
      %53 = vector.load %arg12[%c0_39, %c0_40, %c0_41] : memref<1x128x128xf32, #tpu.memory_space<vmem>>, vector<1x128x128xf32>
      %54 = vector.shape_cast %53 : vector<1x128x128xf32> to vector<128x128xf32>
      %55 = vector.shape_cast %52 : vector<128x128xf32> to vector<1x128x128xf32>
      tpu.vector_store %arg12[%c0_39, %c0_40, %c0_41], %55 {strides = array<i32>} : memref<1x128x128xf32, #tpu.memory_space<vmem>>, vector<1x128x128xf32>,
    } else {
    }
    %c0_i32_34 = arith.constant 0 : i32
    %44 = arith.cmpi ne, %arg2, %c0_i32_34 : i32
    %45 = arith.extui %44 : i1 to i32
    %c0_i32_35 = arith.constant 0 : i32
    %46 = arith.cmpi ne, %45, %c0_i32_35 : i32
    scf.if %46 {
      %c0_37 = arith.constant 0 : index
      %c0_38 = arith.constant 0 : index
      %c0_39 = arith.constant 0 : index
      %50 = vector.load %arg12[%c0_37, %c0_38, %c0_39] : memref<1x128x128xf32, #tpu.memory_space<vmem>>, vector<1x128x128xf32>
      %51 = vector.shape_cast %50 : vector<1x128x128xf32> to vector<128x128xf32>
      %52 = arith.addf %51, %40 : vector<128x128xf32>
      %c0_40 = arith.constant 0 : index
      %c0_41 = arith.constant 0 : index
      %c0_42 = arith.constant 0 : index
      %53 = vector.load %arg12[%c0_40, %c0_41, %c0_42] : memref<1x128x128xf32, #tpu.memory_space<vmem>>, vector<1x128x128xf32>
      %54 = vector.shape_cast %53 : vector<1x128x128xf32> to vector<128x128xf32>
      %55 = vector.shape_cast %52 : vector<128x128xf32> to vector<1x128x128xf32>
      tpu.vector_store %arg12[%c0_40, %c0_41, %c0_42], %55 {strides = array<i32>} : memref<1x128x128xf32, #tpu.memory_space<vmem>>, vector<1x128x128xf32>,
    } else {
    }
    %c3_i32 = arith.constant 3 : i32
    %47 = arith.cmpi eq, %arg2, %c3_i32 : i32
    %48 = arith.extui %47 : i1 to i32
    %c0_i32_36 = arith.constant 0 : i32
    %49 = arith.cmpi ne, %48, %c0_i32_36 : i32
    scf.if %49 {
      %c0_37 = arith.constant 0 : index
      %c0_38 = arith.constant 0 : index
      %c0_39 = arith.constant 0 : index
      %50 = vector.load %arg12[%c0_37, %c0_38, %c0_39] : memref<1x128x128xf32, #tpu.memory_space<vmem>>, vector<1x128x128xf32>
      %51 = vector.shape_cast %50 : vector<1x128x128xf32> to vector<128x128xf32>
      %cst_40 = arith.constant 0.000000e+00 : f32
      %52 = vector.broadcast %cst_40 : f32 to vector<128x128xf32>
      %53 = arith.maximumf %51, %52 : vector<128x128xf32>
      %c0_41 = arith.constant 0 : index
      %c0_42 = arith.constant 0 : index
      %c0_43 = arith.constant 0 : index
      %54 = vector.load %arg12[%c0_41, %c0_42, %c0_43] : memref<1x128x128xf32, #tpu.memory_space<vmem>>, vector<1x128x128xf32>
      %55 = vector.shape_cast %54 : vector<1x128x128xf32> to vector<128x128xf32>
      %56 = vector.shape_cast %53 : vector<128x128xf32> to vector<1x128x128xf32>
      tpu.vector_store %arg12[%c0_41, %c0_42, %c0_43], %56 {strides = array<i32>} : memref<1x128x128xf32, #tpu.memory_space<vmem>>, vector<1x128x128xf32>,
    } else {
    }
    return
  }
  func.func @transform_0(%arg0: i32, %arg1: i32, %arg2: i32) -> (i32, i32, i32) {
    %c0_i32 = arith.constant 0 : i32
    %c0_i32_0 = arith.constant 0 : i32
    return %arg0, %arg1, %c0_i32 : i32, i32, i32
  }
  func.func @transform_1(%arg0: i32, %arg1: i32, %arg2: i32) -> (i32, i32, i32) {
    %c0_i32 = arith.constant 0 : i32
    %c0_i32_0 = arith.constant 0 : i32
    %c0_i32_1 = arith.constant 0 : i32
    return %arg0, %c0_i32, %c0_i32_0 : i32, i32, i32
  }
  func.func @transform_2(%arg0: i32, %arg1: i32, %arg2: i32) -> (i32, i32, i32) {
    %c0_i32 = arith.constant 0 : i32
    %c0_i32_0 = arith.constant 0 : i32
    %c0_i32_1 = arith.constant 0 : i32
    return %arg0, %c0_i32, %c0_i32_0 : i32, i32, i32
  }
  func.func @transform_3(%arg0: i32, %arg1: i32, %arg2: i32) -> (i32, i32, i32) {
    %c0_i32 = arith.constant 0 : i32
    %c0_i32_0 = arith.constant 0 : i32
    return %arg0, %arg1, %c0_i32 : i32, i32, i32
  }
  func.func @transform_4(%arg0: i32, %arg1: i32, %arg2: i32) -> (i32, i32, i32) {
    %c0_i32 = arith.constant 0 : i32
    %c0_i32_0 = arith.constant 0 : i32
    %c0_i32_1 = arith.constant 0 : i32
    return %arg2, %c0_i32, %c0_i32_0 : i32, i32, i32
  }
  func.func @transform_5(%arg0: i32, %arg1: i32, %arg2: i32) -> (i32, i32, i32) {
    %c0_i32 = arith.constant 0 : i32
    %c0_i32_0 = arith.constant 0 : i32
    %c0_i32_1 = arith.constant 0 : i32
    return %arg2, %c0_i32, %c0_i32_0 : i32, i32, i32
  }
  func.func @transform_6(%arg0: i32, %arg1: i32, %arg2: i32) -> (i32, i32, i32) {
    %c0_i32 = arith.constant 0 : i32
    %c0_i32_0 = arith.constant 0 : i32
    %c0_i32_1 = arith.constant 0 : i32
    return %arg2, %c0_i32, %c0_i32_0 : i32, i32, i32
  }
  func.func @transform_7(%arg0: i32, %arg1: i32, %arg2: i32) -> (i32, i32, i32) {
    %c0_i32 = arith.constant 0 : i32
    %c0_i32_0 = arith.constant 0 : i32
    %c0_i32_1 = arith.constant 0 : i32
    return %arg2, %c0_i32, %c0_i32_0 : i32, i32, i32
  }
  func.func @transform_8(%arg0: i32, %arg1: i32, %arg2: i32) -> (i32, i32) {
    %c0_i32 = arith.constant 0 : i32
    %c0_i32_0 = arith.constant 0 : i32
    %c0_i32_1 = arith.constant 0 : i32
    return %c0_i32, %c0_i32_0 : i32, i32
  }
  func.func @transform_9(%arg0: i32, %arg1: i32, %arg2: i32) -> (i32, i32, i32) {
    %c0_i32 = arith.constant 0 : i32
    %c0_i32_0 = arith.constant 0 : i32
    return %arg0, %arg1, %c0_i32 : i32, i32, i32
  }
  func.func @transform_10(%arg0: i32, %arg1: i32, %arg2: i32) -> (i32, i32, i32) {
    %c0_i32 = arith.constant 0 : i32
    return %arg0, %arg1, %arg2 : i32, i32, i32
  }
}

</mosaic_0001>

<bundles_post_ra>
// kernel: multi_head_attention.1
= control target key start
LH: loop header
LB: loop body
LE: loop exit
PB: predicated region body
PF: predicated region fallthrough
CT: control target
= control target key end

     0   :  { %s3359_s0 = inlined_call_operand.vmem [shape: bf16[2,128,128], index: 0, kind: input, shape index: {}]   ;;  %s3360_s1 = inlined_call_operand.vmem [shape: bf16[2,128,128], index: 1, kind: input, shape index: {}]   ;;  %s3361_s2 = inlined_call_operand.vmem [shape: bf16[2,128,128], index: 2, kind: input, shape index: {}]   ;;  %s3362_s3 = inlined_call_operand.vmem [shape: bf16[2,128,128], index: 3, kind: input, shape index: {}]   ;;  %s3363_s4 = inlined_call_operand.vmem [shape: bf16[4,128,32], index: 4, kind: input, shape index: {}]   ;;  %s3364_s5 = inlined_call_operand.vmem [shape: bf16[4,128,32], index: 5, kind: input, shape index: {}]   ;;  %s3365_s6 = inlined_call_operand.vmem [shape: bf16[4,128,32], index: 6, kind: input, shape index: {}]   ;;  %s3366_s7 = inlined_call_operand.vmem [shape: bf16[4,32,128], index: 7, kind: input, shape index: {}]   ;;  %s3367_s8 = inlined_call_operand.vmem [shape: f32[1,128], index: 8, kind: input, shape index: {}]   ;;  %s3368_s9 = inlined_call_operand.hbm [shape: f32[2,128,128], index: 9, kind: output, shape index: {0}]   ;;  %s3369_s10 = inlined_call_operand.hbm [shape: f32[2,128,512], index: 10, kind: output, shape index: {1}]  }
   0x1   :  { %3383 = sst [smem:[#allocation16_spill]] %s3359_s0 }
   0x2   :  { %3384 = sst [smem:[#allocation17_spill]] %s3360_s1 }
   0x3   :  { %3385 = sst [smem:[#allocation18_spill]] %s3361_s2 }
   0x4   :  { %3386 = sst [smem:[#allocation19_spill]] %s3362_s3 }
   0x5   :  { %3387 = sst [smem:[#allocation20_spill]] %s3363_s4 }
   0x6   :  { %3388 = sst [smem:[#allocation21_spill]] %s3364_s5 }
   0x7   :  { %3389 = sst [smem:[#allocation22_spill]] %s3365_s6 }
   0x8   :  { %3390 = sst [smem:[#allocation23_spill]] %s3366_s7 }
   0x9   :  { %3391 = sst [smem:[#allocation24_spill]] %s3367_s8 }
   0xa   :  { %3392 = sst [smem:[#allocation25_spill]] %s3368_s9 }
   0xb   :  { %3393 = sst [smem:[#allocation26_spill]] %s3369_s10 }
   0xc   :  { %16 = vsyncpa [#allocation3], 0 }
   0xd   :  { %18 = vsyncpa [#allocation3 + $0x1], 0 }
   0xe   :  { %19 = vsyncpa [#allocation5], 0 }
   0xf   :  { %21 = vsyncpa [#allocation5 + $0x1], 0  ;;  %s2718_s13 = smov 0   ;;  %s2720_s14 = smov 0  }
  0x10   :  { %s2722_s15 = smov 0   ;;  %s2724_s16 = smov 0  }
  0x11   :  { %s2726_s17 = smov 0   ;;  %s2728_s18 = smov 0  }
  0x12   :  { %s2730_s19 = smov 0   ;;  %s2732_s20 = smov 0  }
  0x13   :  { %s2734_s21 = smov 0   ;;  %s2736_s22 = smov 0  }
  0x14   :  { %s2738_s23 = smov 0  }
  0x15 LB: > { %3394 = sst [smem:[#allocation8_spill]] %s2630_s16  ;;  %s1968_s24 = sadd.s32 4294967295, %s2658_s23   ;;  %s2658_s23 = sphi %s2738_s23, %s27_s23   ;;  %s2654_s22 = sphi %s2736_s22, %s3428_s22   ;;  %s2650_s21 = sphi %s2734_s21, %s3434_s21   ;;  %s2646_s20 = sphi %s2732_s20, %s3426_s20   ;;  %s2642_s19 = sphi %s2730_s19, %s3425_s19   ;;  %s2638_s18 = sphi %s2728_s18, %s3424_s18   ;;  %s2634_s17 = sphi %s2726_s17, %s3433_s17   ;;  %s2630_s16 = sphi %s2724_s16, %s3432_s16   ;;  %s2626_s15 = sphi %s2722_s15, %s3431_s15   ;;  %s2622_s14 = sphi %s2720_s14, %s3430_s14   ;;  %s2618_s13 = sphi %s2718_s13, %s3429_s13  }
  0x16   : > { %3395 = sst [smem:[#allocation9_spill]] %s2638_s18  ;;  %s1969_s25 = sadd.s32 4294967294, %s2658_s23  }
  0x17   : > { %3396 = sst [smem:[#allocation10_spill]] %s2650_s21  ;;  %s39_s26 = sadd.s32 1, %s2650_s21 }
  0x18   : > { %3397 = sst [smem:[#allocation11_spill]] %s2654_s22  ;;  %s46_s27 = sadd.s32 1, %s2654_s22 }
  0x19   : > { %p40_p0 = scmp.ge.s32.totalorder %s39_s26, 4  ;;  %s288_s28 = sadd.s32 1, %s2638_s18 }
  0x1a   : > { %p298_p1 = scmp.ne.s32.totalorder %s2638_s18, %s2634_s17  ;;  %p2780_p2 = scmp.eq.s32.totalorder %s1968_s24, 7 }
  0x1b   : > { %s3436_s26 = smov (%p40_p0, %s39_s26), 0  ;;  %s3438_s27 = smov (!%p40_p0, %s46_s27), %s2654_s22 }
  0x1c   : > { %3399 = sst [smem:[#allocation12_spill]] %s3436_s26  ;;  %p2789_p3 = por %p2780_p2, %p298_p1 }
  0x1d   : > { %p304_p4 = scmp.ne.s32.totalorder %s2634_s17, %s2630_s16  ;;  %p48_p5 = scmp.ge.s32.totalorder %s3438_s27, 2 }
  0x1e   : > { %s3400_s30 = scalar_select %p2789_p3, 1, 0 }
  0x1f   : > { %p2795_p6 = scmp.eq.s32.totalorder %s1969_s25, 7  ;;  %s314_s12 = ssub.s32 %s2650_s21, %s3436_s26 }
  0x20   : > { %3401 = sst [smem:[#allocation13_spill]] %s3400_s30  ;;  %s318_s24 = sadd.s32 1, %s2626_s15 }
  0x21   : > { %s3440_s27 = smov (%p48_p5, %s3438_s27), 0  ;;  %p2806_p7 = por %p2795_p6, %p304_p4 }
  0x22   : > { %3403 = sst [smem:[#allocation14_spill]] %s3440_s27  ;;  %p328_p8 = scmp.ne.s32.totalorder %s2626_s15, %s2622_s14 }
  0x23   : > { %s283_s16 = ssub.s32 %s2654_s22, %s3440_s27  ;;  %p334_p9 = scmp.ne.s32.totalorder %s2622_s14, %s2618_s13 }
  0x24   : > { %p286_p10 = scmp.eq.s32.totalorder %s283_s16, 0  ;;  %s315_s25 = sor.u32 %s314_s12, %s283_s16 }
  0x25   : > { %p316_p11 = scmp.eq.s32.totalorder %s315_s25, 0  ;;  %p2818_p12 = por %p328_p8, %p2780_p2 }
  0x26   : > { %s2823_s26 = scalar_select %p286_p10, %s2638_s18, %s288_s28  }
  0x27   : > { %s2826_s21 = scalar_select %p316_p11, %s2626_s15, %s318_s24  }
  0x28   : > { %3406 = sst [smem:[#allocation15_spill]] %s2823_s26  ;;  %p2830_p13 = por %p334_p9, %p2795_p6 }
  0x29   : > { %p1972_p0 = scmp.ge.s32.totalorder %s2658_s23, 1  ;;  %p430_p1 = scmp.lt.s32.totalorder %s2658_s23, 9 }
  0x2b   : > { %p431_p4 = pnand %p1972_p0, %p430_p1 }
  0x2c   : > { %p546_p2 = scmp.lt.s32.totalorder (!%p431_p4), %s2642_s19, 3  ;;  %s3377_s16 = sand.u32 (!%p431_p4), 1, %s2634_s17  }
  0x2d   : > { %434 = sbr.rel (%p431_p4) target bundleno = 1301 (0x515), region = 56  ;;  %s2846_s11 = sshll.u32 (!%p431_p4), %s3377_s16, 7 }
  0x2e   : > { %s3408_s5 = sld [smem:[#allocation21_spill]] (!%p431_p4)  ;;  %p517_p5 = scmp.lt.s32.totalorder (!%p431_p4), %s2646_s20, 1 }
  0x2f   : > { %s3409_s1 = sld [smem:[#allocation17_spill]] (!%p431_p4)  ;;  %p2207_p6 = scmp.ne.s32.totalorder (!%p431_p4), %s2642_s19, 0 }
  0x30   : > { %s3410_s4 = sld [smem:[#allocation20_spill]] (!%p431_p4) }
  0x31   : > { %s3411_s0 = sld [smem:[#allocation16_spill]] (!%p431_p4) }
  0x32   : > { %s2839_s29 = scalar_select %p546_p2, %s2642_s19, 3  ;;  %vm1148_vm0 = vcmask 261120  }
  0x33   : > { %s518_s12 = scalar_select %p517_p5, %s2646_s20, 1 }
  0x34   : > { %s2842_s28 = sshll.u32 %s2839_s29, 6  ;;  %s3412_s6 = sld [smem:[#allocation22_spill]] }
  0x35   : > { %s555_s25 = scalar_lea.vmem %s3408_s5, %s2842_s28  ;;  %s2854_s24 = sshll.u32 %s518_s12, 6 }
  0x36   : > { %v2265_v0 = vld [vmem:[%s555_s25 + $0x38] sm:$0xff]  ;;  %v2264_v1 = vld [vmem:[%s555_s25 + $0x30] sm:$0xff]  ;;  %v2263_v2 = vld [vmem:[%s555_s25 + $0x28] sm:$0xff]  ;;  %s2860_s27 = scalar_lea.vmem %s3409_s1, %s2854_s24  ;;  %s550_s5 = scalar_lea.vmem %s3410_s4, %s2842_s28 }
  0x37   : > { %2324 = vmatpush.bf16.msra.mxu3 %v2265_v0  ;;  %890 = vmatpush.bf16.msra.mxu1 %v2265_v0  ;;  %v2262_v3 = vld [vmem:[%s555_s25 + $0x20] sm:$0xff]  ;;  %v2261_v4 = vld [vmem:[%s555_s25 + $0x18] sm:$0xff]  ;;  %v2260_v5 = vld [vmem:[%s555_s25 + $0x10] sm:$0xff]  ;;  %s2876_s12 = scalar_lea.vmem %s3411_s0, %s2854_s24  ;;  %s3413_s2 = sld [smem:[#allocation18_spill]] }
  0x38   : > { %v2259_v6 = vld [vmem:[%s555_s25 + $0x8] sm:$0xff]  ;;  %v2258_v7 = vld [vmem:[%s555_s25] sm:$0xff]  ;;  %v2257_v12 = vld [vmem:[%s550_s5 + $0x38] sm:$0xff]  ;;  %s3414_s3 = sld [smem:[#allocation19_spill]] }
  0x39   : > { %v2238_v8 = vld [vmem:[%s2860_s27 + $0x20] sm:$0xff]  ;;  %v2239_v10 = vld [vmem:[%s2860_s27 + $0x28] sm:$0xff]  ;;  %729 = vmatpush.bf16.msra.mxu0 %v2257_v12  ;;  %v2256_v13 = vld [vmem:[%s550_s5 + $0x30] sm:$0xff]  ;;  %2316 = vmatpush.bf16.msra.mxu2 %v2257_v12  ;;  %s3415_s7 = sld [smem:[#allocation23_spill]] }
  0x3a   : > { %v2234_v9 = vld [vmem:[%s2860_s27] sm:$0xff]  ;;  %v2235_v11 = vld [vmem:[%s2860_s27 + $0x8] sm:$0xff]  ;;  %v2240_v16 = vld [vmem:[%s2860_s27 + $0x30] sm:$0xff]  ;;  %s2896_s16 = scalar_lea.vmem %s3412_s6, %s2842_s28  ;;  %s3416_s8 = sld [smem:[#allocation24_spill]] (!%p2207_p6) }
  0x3b   : > { %2325 = vmatpush.bf16.msra.mxu3 %v2264_v1  ;;  %891 = vmatpush.bf16.msra.mxu1 %v2264_v1  ;;  %v2255_v14 = vld [vmem:[%s550_s5 + $0x28] sm:$0xff]  ;;  %v2254_v15 = vld [vmem:[%s550_s5 + $0x20] sm:$0xff]  ;;  %v2236_v17 = vld [vmem:[%s2860_s27 + $0x10] sm:$0xff] }
  0x3c   : > { %v2253_v18 = vld [vmem:[%s550_s5 + $0x18] sm:$0xff]  ;;  %v2252_v19 = vld [vmem:[%s550_s5 + $0x10] sm:$0xff]  ;;  %v2251_v20 = vld [vmem:[%s550_s5 + $0x8] sm:$0xff] }
  0x3d   : > { %730 = vmatpush.bf16.msra.mxu0 %v2256_v13  ;;  %2317 = vmatpush.bf16.msra.mxu2 %v2256_v13  ;;  %v2250_v21 = vld [vmem:[%s550_s5] sm:$0xff]  ;;  %v2241_v22 = vld [vmem:[%s2860_s27 + $0x38] sm:$0xff]  ;;  %v2227_v25 = vld [vmem:[%s2876_s12 + $0x8] sm:$0xff] }
  0x3e   : > { %v2237_v23 = vld [vmem:[%s2860_s27 + $0x18] sm:$0xff]  ;;  %v2226_v24 = vld [vmem:[%s2876_s12] sm:$0xff]  ;;  %v2228_v26 = vld [vmem:[%s2876_s12 + $0x10] sm:$0xff] }
  0x3f   : > { %2326 = vmatpush.bf16.msra.mxu3 %v2263_v2  ;;  %892 = vmatpush.bf16.msra.mxu1 %v2263_v2  ;;  %v2229_v27 = vld [vmem:[%s2876_s12 + $0x18] sm:$0xff]  ;;  %v2230_v35 = vld [vmem:[%s2876_s12 + $0x20] sm:$0xff]  ;;  %v2231_v37 = vld [vmem:[%s2876_s12 + $0x28] sm:$0xff] }
  0x40   : > { %v2273_v40 = vld [vmem:[%s2896_s16 + $0x38] sm:$0xff]  ;;  %v2232_v41 = vld [vmem:[%s2876_s12 + $0x30] sm:$0xff]  ;;  %v2271_v45 = vld [vmem:[%s2896_s16 + $0x28] sm:$0xff] }
  0x41   : > { %731 = vmatpush.bf16.msra.mxu0 %v2255_v14  ;;  %2318 = vmatpush.bf16.msra.mxu2 %v2255_v14  ;;  %v2272_v44 = vld [vmem:[%s2896_s16 + $0x30] sm:$0xff]  ;;  %v2270_v47 = vld [vmem:[%s2896_s16 + $0x20] sm:$0xff]  ;;  %v2269_v49 = vld [vmem:[%s2896_s16 + $0x18] sm:$0xff] }
  0x42   : > { %v2233_v50 = vld [vmem:[%s2876_s12 + $0x38] sm:$0xff]  ;;  %v2268_v54 = vld [vmem:[%s2896_s16 + $0x10] sm:$0xff]  ;;  %v2267_v55 = vld [vmem:[%s2896_s16 + $0x8] sm:$0xff]  ;;  %s2914_s12 = scalar_lea.vmem %s3413_s2, %s2854_s24 }
  0x43   : > { %2327 = vmatpush.bf16.msra.mxu3 %v2262_v3  ;;  %893 = vmatpush.bf16.msra.mxu1 %v2262_v3  ;;  %v2266_v59 = vld [vmem:[%s2896_s16] sm:$0xff]  ;;  %v2243_v3 = vld [vmem:[%s2914_s12 + $0x8] sm:$0xff]  ;;  %v2245_v14 = vld [vmem:[%s2914_s12 + $0x18] sm:$0xff]  ;;  %s2949_s16 = scalar_lea.vmem %s3414_s3, %s2854_s24  ;;  %s3379_s24 = sand.u32 1, %s2622_s14  }
  0x44   : > { %v2242_v61 = vld [vmem:[%s2914_s12] sm:$0xff]  ;;  %s1974_s28 = sshll.u32 %s3379_s24, 7 }
  0x45   : > { %732 = vmatpush.bf16.msra.mxu0 %v2254_v15  ;;  %2319 = vmatpush.bf16.msra.mxu2 %v2254_v15  ;;  %s3056_s25 = scalar_lea.vmem [#allocation4], %s1974_s28 }
  0x47   : > { %2328 = vmatpush.bf16.msra.mxu3 %v2261_v4  ;;  %894 = vmatpush.bf16.msra.mxu1 %v2261_v4 }
  0x49   : > { %733 = vmatpush.bf16.msra.mxu0 %v2253_v18  ;;  %2320 = vmatpush.bf16.msra.mxu2 %v2253_v18  ;;  %v2246_v18 = vld [vmem:[%s2914_s12 + $0x20] sm:$0xff] }
  0x4b   : > { %2329 = vmatpush.bf16.msra.mxu3 %v2260_v5  ;;  %895 = vmatpush.bf16.msra.mxu1 %v2260_v5 }
  0x4d   : > { %734 = vmatpush.bf16.msra.mxu0 %v2252_v19  ;;  %2321 = vmatpush.bf16.msra.mxu2 %v2252_v19 }
  0x4f   : > { %2330 = vmatpush.bf16.msra.mxu3 %v2259_v6  ;;  %896 = vmatpush.bf16.msra.mxu1 %v2259_v6 }
  0x51   : > { %735 = vmatpush.bf16.msra.mxu0 %v2251_v20  ;;  %2322 = vmatpush.bf16.msra.mxu2 %v2251_v20 }
  0x53   : > { %2331 = vmatpush.bf16.msra.mxu3 %v2258_v7  ;;  %897 = vmatpush.bf16.msra.mxu1 %v2258_v7 }
  0x55   : > { %736 = vmatpush.bf16.msra.mxu0 %v2250_v21  ;;  %2323 = vmatpush.bf16.msra.mxu2 %v2250_v21  ;;  %v2247_v21 = vld [vmem:[%s2914_s12 + $0x28] sm:$0xff] }
  0x56   : > { %918 = vmatmul.bf16.vlgmr.msra.gmra.mxu3 %v2238_v8  ;;  %898 = vmatmul.bf16.vlgmr.msra.gmra.mxu1 %v2234_v9 }
  0x58   : > { %737 = vmatmul.bf16.vlgmr.msra.gmra.mxu0 %v2226_v24  ;;  %762 = vmatmul.bf16.vlgmr.msra.gmra.mxu2 %v2231_v37 }
  0x59   : > { %1051 = vmatpush.bf16.msrb.mxu2 %v2273_v40 }
  0x5d   : > { %1052 = vmatpush.bf16.msrb.mxu2 %v2272_v44 }
  0x61   : > { %1053 = vmatpush.bf16.msrb.mxu2 %v2271_v45 }
  0x65   : > { %1054 = vmatpush.bf16.msrb.mxu2 %v2270_v47 }
  0x66   : > { %923 = vmatmul.bf16.gmra.mxu3 %v2239_v10  ;;  %903 = vmatmul.bf16.gmra.mxu1 %v2235_v11  ;;  %v2244_v10 = vld [vmem:[%s2914_s12 + $0x10] sm:$0xff] }
  0x68   : > { %742 = vmatmul.bf16.gmra.mxu0 %v2227_v25  ;;  %767 = vmatmul.bf16.gmra.mxu2 %v2232_v41 }
  0x69   : > { %1055 = vmatpush.bf16.msrb.mxu2 %v2269_v49  ;;  %v2278_v49 = vld [vmem:[%s2949_s16] sm:$0xff]  }
  0x6d   : > { %1056 = vmatpush.bf16.msrb.mxu2 %v2268_v54  ;;  %v2280_v54 = vunpack.c.h.bf16 %v2278_v49 }
  0x71   : > { %1057 = vmatpush.bf16.msrb.mxu2 %v2267_v55 }
  0x75   : > { %1058 = vmatpush.bf16.msrb.mxu2 %v2266_v59  ;;  %v2309_v59 = vld [vmem:[%s2949_s16 + $0x8] sm:$0xff]  }
  0x76   : > { %928 = vmatmul.bf16.gmra.mxu3 %v2240_v16  ;;  %908 = vmatmul.bf16.gmra.mxu1 %v2236_v17 }
  0x78   : > { %747 = vmatmul.bf16.gmra.mxu0 %v2228_v26  ;;  %772 = vmatmul.bf16.gmra.mxu2 %v2233_v50  ;;  %v2279_v50 = vunpack.c.l.bf16 %v2278_v49 }
  0x86   : > { %933 = vmatmul.bf16.gmra.mxu3 %v2241_v22  ;;  %913 = vmatmul.bf16.gmra.mxu1 %v2237_v23 }
  0x88   : > { %752 = vmatmul.bf16.gmra.mxu0 %v2229_v27  ;;  %1059 = vmatmul.bf16.vlgmr.msrb.gmra.mxu2 %v2242_v61  ;;  %v2248_v27 = vld [vmem:[%s2914_s12 + $0x30] sm:$0xff] }
  0x98   : > { %757 = vmatmul.bf16.gmra.mxu0 %v2230_v35  ;;  %1064 = vmatmul.bf16.gmra.mxu2 %v2243_v3 }
  0xa8   : > { %1069 = vmatmul.bf16.gmra.mxu2 %v2244_v10 }
  0xb8   : > { %1074 = vmatmul.bf16.gmra.mxu2 %v2245_v14 }
  0xc8   : > { %1079 = vmatmul.bf16.gmra.mxu2 %v2246_v18 }
  0xd3   : > { %v2884_v28 = vpop.f32.mrf.mxu1 }
  0xd5   : > { %v738_v5 = vpop.f32.mrf.mxu0 }
  0xd8   : > { %1084 = vmatmul.bf16.gmra.mxu2 %v2247_v21 }
  0xd9   : > { %v919_v29 = vpop.f32.mrf.mxu3 }
  0xdb   : > { %v2886_v30 = vpop.f32.mrf.mxu1  ;;  %v763_v24 = vpop.f32.mrf.mxu2 }
  0xdc   : > { %v1108_v31 = vpack.c.bf16 %v2886_v30, %v2884_v28 }
  0xdd   : > { %v740_v8 = vpop.f32.mrf.mxu0 }
  0xde   : > { %v1174_v13 = vsel %vm1148_vm0, %v1108_v31, 0  ;;  %v1100_v15 = vpack.c.bf16 %v740_v8, %v738_v5 }
  0xe1   : > { %v921_v32 = vpop.f32.mrf.mxu3 }
  0xe2   : > { %v1112_v33 = vpack.c.bf16 %v921_v32, %v919_v29 }
  0xe3   : > { %v904_v39 = vpop.f32.mrf.mxu1  ;;  %v765_v26 = vpop.f32.mrf.mxu2 }
  0xe4   : > { %v1186_v0 = vsel %vm1148_vm0, %v1112_v33, 0  ;;  %v1105_v37 = vpack.c.bf16 %v765_v26, %v763_v24 }
  0xe5   : > { %v743_v12 = vpop.f32.mrf.mxu0 }
  0xe8   : > { %1089 = vmatmul.bf16.gmra.mxu2 %v2248_v27 }
  0xe9   : > { %v924_v34 = vpop.f32.mrf.mxu3 }
  0xeb   : > { %v906_v43 = vpop.f32.mrf.mxu1  ;;  %v768_v30 = vpop.f32.mrf.mxu2 }
  0xec   : > { %v1109_v9 = vpack.c.bf16 %v906_v43, %v904_v39 }
  0xed   : > { %v745_v16 = vpop.f32.mrf.mxu0 }
  0xee   : > { %v1177_v11 = vsel %vm1148_vm0, %v1109_v9, 0  ;;  %v1101_v19 = vpack.c.bf16 %v745_v16, %v743_v12 }
  0xf1   : > { %v926_v36 = vpop.f32.mrf.mxu3 }
  0xf2   : > { %v1113_v60 = vpack.c.bf16 %v926_v36, %v924_v34  ;;  %v2249_v34 = vld [vmem:[%s2914_s12 + $0x38] sm:$0xff]  ;;  %s2225_s12 = sshll.u32 %s2839_s29, 4  ;;  %s3161_s29 = scalar_lea.vmem [#allocation2], %s2846_s11 }
  0xf3   : > { %v909_v48 = vpop.f32.mrf.mxu1  ;;  %v770_v32 = vpop.f32.mrf.mxu2 }
  0xf4   : > { %v1189_v63 = vsel %vm1148_vm0, %v1113_v60, 0  ;;  %v1106_v40 = vpack.c.bf16 %v770_v32, %v768_v30  ;;  %v2283_v60 = vunpack.c.l.bf16 %v2309_v59 }
  0xf5   : > { %v748_v17 = vpop.f32.mrf.mxu0 }
  0xf8   : > { %1094 = vmatmul.bf16.gmra.mxu2 %v2249_v34 }
  0xf9   : > { %v929_v38 = vpop.f32.mrf.mxu3 }
  0xfb   : > { %v911_v57 = vpop.f32.mrf.mxu1  ;;  %v773_v35 = vpop.f32.mrf.mxu2 }
  0xfc   : > { %v1110_v6 = vpack.c.bf16 %v911_v57, %v909_v48 }
  0xfd   : > { %v750_v20 = vpop.f32.mrf.mxu0 }
  0xfe   : > { %v1180_v7 = vsel %vm1148_vm0, %v1110_v6, 0  ;;  %v1102_v23 = vpack.c.bf16 %v750_v20, %v748_v17 }
 0x101   : > { %v931_v42 = vpop.f32.mrf.mxu3 }
 0x102   : > { %v1114_v56 = vpack.c.bf16 %v931_v42, %v929_v38 }
 0x103   : > { %v914_v62 = vpop.f32.mrf.mxu1  ;;  %v775_v36 = vpop.f32.mrf.mxu2 }
 0x104   : > { %v1192_v58 = vsel %vm1148_vm0, %v1114_v56, 0  ;;  %v1107_v44 = vpack.c.bf16 %v775_v36, %v773_v35 }
 0x105   : > { %v753_v22 = vpop.f32.mrf.mxu0 }
 0x109   : > { %v934_v46 = vpop.f32.mrf.mxu3 }
 0x10b   : > { %v916_v1 = vpop.f32.mrf.mxu1  ;;  %v1060_v38 = vpop.f32.mrf.mxu2 }
 0x10c   : > { %v1111_v2 = vpack.c.bf16 %v916_v1, %v914_v62 }
 0x10d   : > { %v755_v25 = vpop.f32.mrf.mxu0 }
 0x10e   : > { %v1183_v4 = vsel %vm1148_vm0, %v1111_v2, 0  ;;  %v1103_v28 = vpack.c.bf16 %v755_v25, %v753_v22  ;;  %v2312_v22 = vld [vmem:[%s2949_s16 + $0x20] sm:$0xff]  }
 0x111   : > { %v936_v51 = vpop.f32.mrf.mxu3 }
 0x112   : > { %v1115_v52 = vpack.c.bf16 %v936_v51, %v934_v46 }
 0x113   : > { %v1062_v39 = vpop.f32.mrf.mxu2 }
 0x114   : > { %v1195_v53 = vsel %vm1148_vm0, %v1115_v52, 0  ;;  %v2939_v41 = vpack.c.bf16 %v1062_v39, %v1060_v38 }
 0x115   : > { %1197 = vmatpush.bf16.xpose.msrb.mxu3 %v1195_v53  ;;  %v758_v29 = vpop.f32.mrf.mxu0 }
 0x11b   : > { %v1065_v42 = vpop.f32.mrf.mxu2 }
 0x11d   : > { %1198 = vmatpush.bf16.xpose.msrb.mxu3 %v1192_v58  ;;  %v760_v31 = vpop.f32.mrf.mxu0 }
 0x11e   : > { %v1104_v33 = vpack.c.bf16 %v760_v31, %v758_v29 }
 0x123   : > { %v1067_v43 = vpop.f32.mrf.mxu2 }
 0x124   : > { %v2942_v45 = vpack.c.bf16 %v1067_v43, %v1065_v42  ;;  %v2296_v42 = vunpack.c.h.bf16 %v2312_v22 }
 0x125   : > { %1199 = vmatpush.bf16.xpose.msrb.mxu3 %v1189_v63 }
 0x12b   : > { %v1070_v46 = vpop.f32.mrf.mxu2 }
 0x12d   : > { %1200 = vmatpush.bf16.xpose.msrb.mxu3 %v1186_v0  ;;  %v2284_v0 = vunpack.c.h.bf16 %v2309_v59 }
 0x133   : > { %v1072_v47 = vpop.f32.mrf.mxu2 }
 0x134   : > { %v2951_v48 = vpack.c.bf16 %v1072_v47, %v1070_v46  ;;  %v2313_v46 = vld [vmem:[%s2949_s16 + $0x28] sm:$0xff]  }
 0x135   : > { %1201 = vmatpush.bf16.xpose.msrb.mxu3 %v1183_v4  ;;  %v2310_v4 = vld [vmem:[%s2949_s16 + $0x10] sm:$0xff]  }
 0x136   : > { %v2287_v5 = vunpack.c.l.bf16 %v2310_v4  ;;  %v2288_v9 = vunpack.c.h.bf16 %v2310_v4 }
 0x13b   : > { %v1075_v52 = vpop.f32.mrf.mxu2 }
 0x13d   : > { %1202 = vmatpush.bf16.xpose.msrb.mxu3 %v1180_v7 }
 0x143   : > { %v1077_v56 = vpop.f32.mrf.mxu2 }
 0x144   : > { %v1417_v58 = vpack.c.bf16 %v1077_v56, %v1075_v52 }
 0x145   : > { %1203 = vmatpush.bf16.xpose.msrb.mxu3 %v1177_v11 }
 0x14b   : > { %v1080_v62 = vpop.f32.mrf.mxu2 }
 0x14d   : > { %1204 = vmatpush.bf16.xpose.msrb.mxu3 %v1174_v13  ;;  %v2311_v13 = vld [vmem:[%s2949_s16 + $0x18] sm:$0xff]  }
 0x14e   : > { %v2291_v14 = vunpack.c.l.bf16 %v2311_v13  ;;  %v2292_v18 = vunpack.c.h.bf16 %v2311_v13 }
 0x153   : > { %v1082_v2 = vpop.f32.mrf.mxu2 }
 0x154   : > { %2183 = vmatmul.msk.bf16.vlgmr.msrb.gmra.mxu3 %vm1148_vm0, %v1100_v15  ;;  %v1418_v31 = vpack.c.bf16 %v1082_v2, %v1080_v62 }
 0x15b   : > { %v1085_v7 = vpop.f32.mrf.mxu2 }
 0x163   : > { %v1087_v11 = vpop.f32.mrf.mxu2 }
 0x164   : > { %2184 = vmatmul.msk.bf16.gmra.mxu3 %vm1148_vm0, %v1101_v19  ;;  %v1419_v30 = vpack.c.bf16 %v1087_v11, %v1085_v7  ;;  %v2315_v11 = vld [vmem:[%s2949_s16 + $0x38] sm:$0xff]  }
 0x16b   : > { %v1090_v16 = vpop.f32.mrf.mxu2 }
 0x173   : > { %v1092_v20 = vpop.f32.mrf.mxu2 }
 0x174   : > { %2185 = vmatmul.msk.bf16.gmra.mxu3 %vm1148_vm0, %v1102_v23  ;;  %v2295_v23 = vunpack.c.l.bf16 %v2312_v22  ;;  %v1420_v29 = vpack.c.bf16 %v1092_v20, %v1090_v16  ;;  %v2308_v20 = vunpack.c.h.bf16 %v2315_v11 }
 0x17b   : > { %v1095_v25 = vpop.f32.mrf.mxu2 }
 0x183   : > { %v1097_v27 = vpop.f32.mrf.mxu2 }
 0x184   : > { %2186 = vmatmul.msk.bf16.gmra.mxu3 %vm1148_vm0, %v1103_v28  ;;  %v1421_v28 = vpack.c.bf16 %v1097_v27, %v1095_v25 }
 0x186   : > { %1422 = vmatpush.bf16.msrb.mxu0 %v1421_v28  ;;  %2332 = vmatpush.bf16.msra.mxu2 %v1421_v28 }
 0x18a   : > { %1423 = vmatpush.bf16.msrb.mxu0 %v1420_v29  ;;  %2333 = vmatpush.bf16.msra.mxu2 %v1420_v29 }
 0x18e   : > { %1424 = vmatpush.bf16.msrb.mxu0 %v1419_v30  ;;  %2334 = vmatpush.bf16.msra.mxu2 %v1419_v30 }
 0x192   : > { %1425 = vmatpush.bf16.msrb.mxu0 %v1418_v31  ;;  %2335 = vmatpush.bf16.msra.mxu2 %v1418_v31 }
 0x194   : > { %2187 = vmatmul.msk.bf16.gmra.mxu3 %vm1148_vm0, %v1104_v33 }
 0x196   : > { %1426 = vmatpush.bf16.msrb.mxu0 %v1417_v58  ;;  %2336 = vmatpush.bf16.msra.mxu2 %v1417_v58 }
 0x19a   : > { %1427 = vmatpush.bf16.msrb.mxu0 %v2951_v48  ;;  %2337 = vmatpush.bf16.msra.mxu2 %v2951_v48  ;;  %v2299_v48 = vunpack.c.l.bf16 %v2313_v46 }
 0x19e   : > { %1428 = vmatpush.bf16.msrb.mxu0 %v2942_v45  ;;  %2338 = vmatpush.bf16.msra.mxu2 %v2942_v45 }
 0x1a2   : > { %1429 = vmatpush.bf16.msrb.mxu0 %v2939_v41  ;;  %2339 = vmatpush.bf16.msra.mxu2 %v2939_v41 }
 0x1a4   : > { %2188 = vmatmul.msk.bf16.gmra.mxu3 %vm1148_vm0, %v1105_v37 }
 0x1b4   : > { %2189 = vmatmul.msk.bf16.gmra.mxu3 %vm1148_vm0, %v1106_v40 }
 0x1c4   : > { %2190 = vmatmul.msk.bf16.gmra.mxu3 %vm1148_vm0, %v1107_v44 }
 0x1d7   : > { %v1206_v51 = vpop.f32.mrf.mxu3 }
 0x1d8   : > { %v2954_v53 = vadd.f32 %v2279_v50, %v1206_v51 }
 0x1da   : > { %1246 = vmax.xlane.f32.xlu0 %v2954_v53 }
 0x1df   : > { %v1208_v55 = vpop.f32.mrf.mxu3 }
 0x1e0   : > { %v2957_v57 = vadd.f32 %v2280_v54, %v1208_v55  ;;  %v2300_v55 = vunpack.c.h.bf16 %v2313_v46 }
 0x1e2   : > { %1248 = vmax.xlane.f32.xlu0 %v2957_v57 }
 0x1e7   : > { %v1211_v61 = vpop.f32.mrf.mxu3 }
 0x1e8   : > { %v2961_v63 = vadd.f32 %v2283_v60, %v1211_v61  ;;  %v2314_v61 = vld [vmem:[%s2949_s16 + $0x30] sm:$0xff]   ;;  %s565_s16 = scalar_lea.vmem %s3415_s7, %s2225_s12 }
 0x1ea   : > { %1250 = vmax.xlane.f32.xlu1 %v2961_v63 }
 0x1ef   : > { %v1213_v1 = vpop.f32.mrf.mxu3 }
 0x1f0   : > { %v2964_v3 = vadd.f32 %v2284_v0, %v1213_v1 }
 0x1f2   : > { %1252 = vmax.xlane.f32.xlu1 %v2964_v3 }
 0x1f7   : > { %v1216_v6 = vpop.f32.mrf.mxu3 }
 0x1f8   : > { %v2968_v8 = vadd.f32 %v2287_v5, %v1216_v6  ;;  %v2304_v6 = vunpack.c.h.bf16 %v2314_v61 }
 0x1fa   : > { %1254 = vmax.xlane.f32.xlu2 %v2968_v8 }
 0x1ff   : > { %v1218_v10 = vpop.f32.mrf.mxu3 }
 0x200   : > { %v2971_v12 = vadd.f32 %v2288_v9, %v1218_v10 }
 0x202   : > { %1256 = vmax.xlane.f32.xlu2 %v2971_v12 }
 0x207   : > { %v1221_v15 = vpop.f32.mrf.mxu3 }
 0x208   : > { %v2975_v17 = vadd.f32 %v2291_v14, %v1221_v15  ;;  %v2307_v14 = vunpack.c.l.bf16 %v2315_v11 }
 0x20a   : > { %1258 = vmax.xlane.f32.xlu0 %v2975_v17 }
 0x20f   : > { %v1223_v19 = vpop.f32.mrf.mxu3 }
 0x210   : > { %v2978_v21 = vadd.f32 %v2292_v18, %v1223_v19 }
 0x212   : > { %1260 = vmax.xlane.f32.xlu1 %v2978_v21 }
 0x217   : > { %v1226_v24 = vpop.f32.mrf.mxu3 }
 0x218   : > { %v2982_v26 = vadd.f32 %v2295_v23, %v1226_v24 }
 0x21a   : > { %1262 = vmax.xlane.f32.xlu1 %v2982_v26 }
 0x21f   : > { %v1228_v35 = vpop.f32.mrf.mxu3 }
 0x220   : > { %v2997_v44 = vadd.f32 %v2296_v42, %v1228_v35 }
 0x227   : > { %v1231_v40 = vpop.f32.mrf.mxu3 }
 0x228   : > { %v3005_v52 = vadd.f32 %v2299_v48, %v1231_v40 }
 0x22f   : > { %v1233_v49 = vpop.f32.mrf.mxu3 }
 0x230   : > { %v3012_v59 = vadd.f32 %v2300_v55, %v1233_v49 }
 0x24d   : > { %v1247_v32 = vpop.xlane.xlu0 %1246 }
 0x24e   : > { %v1278_v33 = vsub.f32 %v2954_v53, %v1247_v32 }
 0x250   : > { %v1294_v34 = vmul.f32 1.442695, %v1278_v33 }
 0x252   : > { %2443 = vpow2.f32 %v1294_v34 }
 0x255   : > { %v1249_v36 = vpop.xlane.xlu0 %1248 }
 0x256   : > { %v1279_v37 = vsub.f32 %v2957_v57, %v1249_v36  ;;  %v1236_v57 = vpop.f32.mrf.mxu3 }
 0x258   : > { %v2993_v38 = vpop.eup %2443  ;;  %v1296_v39 = vmul.f32 1.442695, %v1279_v37 }
 0x259   : > { %1326 = vadd.xlane.f32.xlu2 %v2993_v38 }
 0x25a   : > { %2445 = vpow2.f32 %v1296_v39 }
 0x25d   : > { %v1251_v43 = vpop.xlane.xlu1 %1250 }
 0x25e   : > { %v1280_v41 = vsub.f32 %v2961_v63, %v1251_v43  ;;  %v2303_v63 = vunpack.c.l.bf16 %v2314_v61  ;;  %v1238_v4 = vpop.f32.mrf.mxu3 }
 0x25f   : > { %v3027_v9 = vadd.f32 %v2304_v6, %v1238_v4 }
 0x260   : > { %v2999_v45 = vpop.eup %2445  ;;  %v1298_v47 = vmul.f32 1.442695, %v1280_v41  ;;  %v3020_v2 = vadd.f32 %v2303_v63, %v1236_v57 }
 0x261   : > { %1328 = vadd.xlane.f32.xlu0 %v2999_v45  ;;  %1264 = vmax.xlane.f32.xlu2 %v2997_v44 }
 0x262   : > { %2447 = vpow2.f32 %v1298_v47 }
 0x265   : > { %v1253_v50 = vpop.xlane.xlu1 %1252 }
 0x266   : > { %v1281_v51 = vsub.f32 %v2964_v3, %v1253_v50  ;;  %v1241_v13 = vpop.f32.mrf.mxu3 }
 0x267   : > { %v3035_v18 = vadd.f32 %v2307_v14, %v1241_v13 }
 0x268   : > { %v3007_v53 = vpop.eup %2447  ;;  %v1300_v54 = vmul.f32 1.442695, %v1281_v51 }
 0x269   : > { %1330 = vadd.xlane.f32.xlu0 %v3007_v53  ;;  %1266 = vmax.xlane.f32.xlu2 %v3005_v52 }
 0x26a   : > { %2449 = vpow2.f32 %v1300_v54 }
 0x26d   : > { %v1255_v56 = vpop.xlane.xlu2 %1254 }
 0x26e   : > { %v1282_v58 = vsub.f32 %v2968_v8, %v1255_v56  ;;  %v1243_v22 = vpop.f32.mrf.mxu3 }
 0x26f   : > { %v3042_v25 = vadd.f32 %v2308_v20, %v1243_v22 }
 0x270   : > { %v3014_v60 = vpop.eup %2449  ;;  %v1302_v62 = vmul.f32 1.442695, %v1282_v58 }
 0x271   : > { %1268 = vmax.xlane.f32.xlu0 %v3012_v59  ;;  %1332 = vadd.xlane.f32.xlu1 %v3014_v60 }
 0x272   : > { %2451 = vpow2.f32 %v1302_v62 }
 0x275   : > { %v1257_v0 = vpop.xlane.xlu2 %1256 }
 0x276   : > { %v1283_v1 = vsub.f32 %v2971_v12, %v1257_v0 }
 0x278   : > { %v3022_v3 = vpop.eup %2451  ;;  %v1304_v5 = vmul.f32 1.442695, %v1283_v1 }
 0x279   : > { %1270 = vmax.xlane.f32.xlu0 %v3020_v2  ;;  %1334 = vadd.xlane.f32.xlu1 %v3022_v3 }
 0x27a   : > { %2453 = vpow2.f32 %v1304_v5 }
 0x27d   : > { %v1259_v7 = vpop.xlane.xlu0 %1258 }
 0x27e   : > { %v1284_v8 = vsub.f32 %v2975_v17, %v1259_v7 }
 0x280   : > { %v3029_v10 = vpop.eup %2453  ;;  %v1306_v12 = vmul.f32 1.442695, %v1284_v8 }
 0x281   : > { %1336 = vadd.xlane.f32.xlu2 %v3029_v10  ;;  %1272 = vmax.xlane.f32.xlu1 %v3027_v9 }
 0x282   : > { %2455 = vpow2.f32 %v1306_v12 }
 0x285   : > { %v1261_v15 = vpop.xlane.xlu1 %1260 }
 0x286   : > { %v1285_v16 = vsub.f32 %v2978_v21, %v1261_v15 }
 0x288   : > { %v3037_v19 = vpop.eup %2455  ;;  %v1308_v17 = vmul.f32 1.442695, %v1285_v16 }
 0x289   : > { %1338 = vadd.xlane.f32.xlu2 %v3037_v19  ;;  %1274 = vmax.xlane.f32.xlu1 %v3035_v18 }
 0x28a   : > { %2457 = vpow2.f32 %v1308_v17 }
 0x28d   : > { %v1263_v23 = vpop.xlane.xlu1 %1262 }
 0x28e   : > { %v1286_v24 = vsub.f32 %v2982_v26, %v1263_v23 }
 0x290   : > { %v3044_v21 = vpop.eup %2457  ;;  %v1310_v27 = vmul.f32 1.442695, %v1286_v24  ;;  %v2275_v24 = vld [vmem:[%s565_s16 + $0x8] sm:$0xff] }
 0x291   : > { %1340 = vadd.xlane.f32.xlu0 %v3044_v21  ;;  %1276 = vmax.xlane.f32.xlu2 %v3042_v25 }
 0x292   : > { %2459 = vpow2.f32 %v1310_v27  ;;  %1525 = vmatpush.bf16.msrb.mxu1 %v2275_v24 }
 0x298   : > { %v3048_v28 = vpop.eup %2459 }
 0x299   : > { %1342 = vadd.xlane.f32.xlu0 %v3048_v28 }
 0x2cc   : > { %v1327_v29 = vpop.xlane.xlu2 %1326 }
 0x2cd   : > { %2461 = vrcp.f32 %v1327_v29 }
 0x2d3   : > { %v2462_v26 = vpop.eup %2461 }
 0x2d4   : > { %v1329_v30 = vpop.xlane.xlu0 %1328  ;;  %v1265_v31 = vpop.xlane.xlu2 %1264  ;;  %v1374_v32 = vmul.f32 %v2462_v26, %v2993_v38 }
 0x2d5   : > { %2463 = vrcp.f32 %v1329_v30  ;;  %v1287_v33 = vsub.f32 %v2997_v44, %v1265_v31 }
 0x2d6   : > { %1390 = vst [vmem:[%s3056_s25] sm:$0xff] %v1374_v32 }
 0x2d7   : > { %v1312_v34 = vmul.f32 1.442695, %v1287_v33 }
 0x2d9   : > { %2465 = vpow2.f32 %v1312_v34 }
 0x2db   : > { %v2464_v35 = vpop.eup %2463 }
 0x2dc   : > { %v1331_v36 = vpop.xlane.xlu0 %1330  ;;  %v1267_v37 = vpop.xlane.xlu2 %1266  ;;  %v1375_v39 = vmul.f32 %v2464_v35, %v2999_v45 }
 0x2dd   : > { %2467 = vrcp.f32 %v1331_v36  ;;  %v1288_v40 = vsub.f32 %v3005_v52, %v1267_v37 }
 0x2de   : > { %1391 = vst [vmem:[%s3056_s25 + $0x8] sm:$0xff] %v1375_v39  ;;  %v1406_v38 = vpack.c.bf16 %v1375_v39, %v1374_v32 }
 0x2df   : > { %v3062_v42 = vpop.eup %2465  ;;  %v1314_v43 = vmul.f32 1.442695, %v1288_v40 }
 0x2e0   : > { %1430 = vmatmul.bf16.vlgmr.msrb.gmra.mxu0 %v1406_v38  ;;  %1344 = vadd.xlane.f32.xlu1 %v3062_v42 }
 0x2e1   : > { %2469 = vpow2.f32 %v1314_v43 }
 0x2e3   : > { %v2468_v41 = vpop.eup %2467 }
 0x2e4   : > { %v1269_v44 = vpop.xlane.xlu0 %1268  ;;  %v1333_v46 = vpop.xlane.xlu1 %1332  ;;  %v1376_v47 = vmul.f32 %v2468_v41, %v3007_v53 }
 0x2e5   : > { %v1289_v45 = vsub.f32 %v3012_v59, %v1269_v44  ;;  %2471 = vrcp.f32 %v1333_v46 }
 0x2e6   : > { %1392 = vst [vmem:[%s3056_s25 + $0x10] sm:$0xff] %v1376_v47 }
 0x2e7   : > { %v3068_v48 = vpop.eup %2469  ;;  %v1316_v49 = vmul.f32 1.442695, %v1289_v45 }
 0x2e8   : > { %1346 = vadd.xlane.f32.xlu2 %v3068_v48 }
 0x2e9   : > { %2473 = vpow2.f32 %v1316_v49 }
 0x2eb   : > { %v2472_v50 = vpop.eup %2471 }
 0x2ec   : > { %v1271_v51 = vpop.xlane.xlu0 %1270  ;;  %v1335_v52 = vpop.xlane.xlu1 %1334  ;;  %v1377_v54 = vmul.f32 %v2472_v50, %v3014_v60 }
 0x2ed   : > { %v1290_v55 = vsub.f32 %v3020_v2, %v1271_v51  ;;  %2475 = vrcp.f32 %v1335_v52 }
 0x2ee   : > { %1393 = vst [vmem:[%s3056_s25 + $0x18] sm:$0xff] %v1377_v54  ;;  %v1407_v53 = vpack.c.bf16 %v1377_v54, %v1376_v47 }
 0x2ef   : > { %v3074_v56 = vpop.eup %2473  ;;  %v1318_v57 = vmul.f32 1.442695, %v1290_v55 }
 0x2f0   : > { %1348 = vadd.xlane.f32.xlu0 %v3074_v56  ;;  %1435 = vmatmul.bf16.gmra.mxu0 %v1407_v53 }
 0x2f1   : > { %2477 = vpow2.f32 %v1318_v57 }
 0x2f3   : > { %v2476_v58 = vpop.eup %2475 }
 0x2f4   : > { %v1337_v59 = vpop.xlane.xlu2 %1336  ;;  %v1273_v61 = vpop.xlane.xlu1 %1272  ;;  %v1378_v62 = vmul.f32 %v2476_v58, %v3022_v3 }
 0x2f5   : > { %2479 = vrcp.f32 %v1337_v59  ;;  %v1291_v60 = vsub.f32 %v3027_v9, %v1273_v61 }
 0x2f6   : > { %1394 = vst [vmem:[%s3056_s25 + $0x20] sm:$0xff] %v1378_v62 }
 0x2f7   : > { %v3080_v63 = vpop.eup %2477  ;;  %v1320_v0 = vmul.f32 1.442695, %v1291_v60 }
 0x2f8   : > { %1350 = vadd.xlane.f32.xlu1 %v3080_v63 }
 0x2f9   : > { %2481 = vpow2.f32 %v1320_v0 }
 0x2fb   : > { %v2480_v1 = vpop.eup %2479 }
 0x2fc   : > { %v1339_v2 = vpop.xlane.xlu2 %1338  ;;  %v1275_v4 = vpop.xlane.xlu1 %1274  ;;  %v1379_v5 = vmul.f32 %v2480_v1, %v3029_v10 }
 0x2fd   : > { %2483 = vrcp.f32 %v1339_v2  ;;  %v1292_v6 = vsub.f32 %v3035_v18, %v1275_v4 }
 0x2fe   : > { %1395 = vst [vmem:[%s3056_s25 + $0x28] sm:$0xff] %v1379_v5  ;;  %v1408_v3 = vpack.c.bf16 %v1379_v5, %v1378_v62 }
 0x2ff   : > { %v3086_v7 = vpop.eup %2481  ;;  %v1322_v8 = vmul.f32 1.442695, %v1292_v6 }
 0x300   : > { %1440 = vmatmul.bf16.gmra.mxu0 %v1408_v3  ;;  %1352 = vadd.xlane.f32.xlu2 %v3086_v7 }
 0x301   : > { %2485 = vpow2.f32 %v1322_v8 }
 0x303   : > { %v2484_v9 = vpop.eup %2483 }
 0x304   : > { %v1341_v11 = vpop.xlane.xlu0 %1340  ;;  %v1277_v12 = vpop.xlane.xlu2 %1276  ;;  %v1380_v13 = vmul.f32 %v2484_v9, %v3037_v19 }
 0x305   : > { %2487 = vrcp.f32 %v1341_v11  ;;  %v1293_v10 = vsub.f32 %v3042_v25, %v1277_v12  ;;  %v2274_v25 = vld [vmem:[%s565_s16] sm:$0xff] }
 0x306   : > { %1396 = vst [vmem:[%s3056_s25 + $0x30] sm:$0xff] %v1380_v13  ;;  %1526 = vmatpush.bf16.msrb.mxu1 %v2274_v25 }
 0x307   : > { %v3092_v14 = vpop.eup %2485  ;;  %v1324_v15 = vmul.f32 1.442695, %v1293_v10 }
 0x308   : > { %1354 = vadd.xlane.f32.xlu0 %v3092_v14 }
 0x309   : > { %2489 = vpow2.f32 %v1324_v15 }
 0x30b   : > { %v2488_v16 = vpop.eup %2487 }
 0x30c   : > { %v1343_v18 = vpop.xlane.xlu0 %1342  ;;  %v1381_v17 = vmul.f32 %v2488_v16, %v3044_v21 }
 0x30d   : > { %2491 = vrcp.f32 %v1343_v18 }
 0x30e   : > { %1397 = vst [vmem:[%s3056_s25 + $0x38] sm:$0xff] %v1381_v17  ;;  %v1409_v20 = vpack.c.bf16 %v1381_v17, %v1380_v13 }
 0x30f   : > { %v3097_v19 = vpop.eup %2489 }
 0x310   : > { %1356 = vadd.xlane.f32.xlu1 %v3097_v19  ;;  %1445 = vmatmul.bf16.gmra.mxu0 %v1409_v20 }
 0x313   : > { %v2492_v22 = vpop.eup %2491 }
 0x314   : > { %v1382_v23 = vmul.f32 %v2492_v22, %v3048_v28 }
 0x316   : > { %1398 = vst [vmem:[%s3056_s25 + $0x40] sm:$0xff] %v1382_v23 }
 0x353   : > { %v1345_v21 = vpop.xlane.xlu1 %1344 }
 0x354   : > { %2493 = vrcp.f32 %v1345_v21 }
 0x35a   : > { %v2494_v27 = vpop.eup %2493 }
 0x35b   : > { %v1347_v29 = vpop.xlane.xlu2 %1346  ;;  %v1383_v26 = vmul.f32 %v2494_v27, %v3062_v42 }
 0x35c   : > { %2495 = vrcp.f32 %v1347_v29 }
 0x35d   : > { %v1431_v30 = vpop.f32.mrf.mxu0  ;;  %1399 = vst [vmem:[%s3056_s25 + $0x48] sm:$0xff] %v1383_v26  ;;  %v1410_v28 = vpack.c.bf16 %v1383_v26, %v1382_v23 }
 0x35f   : > { %1450 = vmatmul.bf16.gmra.mxu0 %v1410_v28 }
 0x362   : > { %v2496_v31 = vpop.eup %2495 }
 0x363   : > { %v1349_v32 = vpop.xlane.xlu0 %1348  ;;  %v1384_v33 = vmul.f32 %v2496_v31, %v3068_v48 }
 0x364   : > { %2497 = vrcp.f32 %v1349_v32 }
 0x365   : > { %v1433_v34 = vpop.f32.mrf.mxu0  ;;  %1400 = vst [vmem:[%s3056_s25 + $0x50] sm:$0xff] %v1384_v33 }
 0x366   : > { %v1471_v35 = vpack.c.bf16 %v1433_v34, %v1431_v30 }
 0x368   : > { %2199 = vmatmul.msk.bf16.vlgmr.msrb.gmra.mxu1 %vm1148_vm0, %v1471_v35 }
 0x36a   : > { %v2498_v36 = vpop.eup %2497 }
 0x36b   : > { %v1351_v37 = vpop.xlane.xlu1 %1350  ;;  %v1385_v39 = vmul.f32 %v2498_v36, %v3074_v56 }
 0x36c   : > { %2499 = vrcp.f32 %v1351_v37 }
 0x36d   : > { %v1436_v40 = vpop.f32.mrf.mxu0  ;;  %1401 = vst [vmem:[%s3056_s25 + $0x58] sm:$0xff] %v1385_v39  ;;  %v1411_v38 = vpack.c.bf16 %v1385_v39, %v1384_v33 }
 0x36f   : > { %1455 = vmatmul.bf16.gmra.mxu0 %v1411_v38 }
 0x372   : > { %v2500_v42 = vpop.eup %2499 }
 0x373   : > { %v1353_v43 = vpop.xlane.xlu2 %1352  ;;  %v1386_v41 = vmul.f32 %v2500_v42, %v3080_v63 }
 0x374   : > { %2501 = vrcp.f32 %v1353_v43 }
 0x375   : > { %v1438_v44 = vpop.f32.mrf.mxu0  ;;  %1402 = vst [vmem:[%s3056_s25 + $0x60] sm:$0xff] %v1386_v41 }
 0x376   : > { %v1472_v46 = vpack.c.bf16 %v1438_v44, %v1436_v40 }
 0x378   : > { %2200 = vmatmul.msk.bf16.gmra.mxu1 %vm1148_vm0, %v1472_v46 }
 0x37a   : > { %v2502_v47 = vpop.eup %2501 }
 0x37b   : > { %v1355_v45 = vpop.xlane.xlu0 %1354  ;;  %v1387_v48 = vmul.f32 %v2502_v47, %v3086_v7 }
 0x37c   : > { %2503 = vrcp.f32 %v1355_v45 }
 0x37d   : > { %v1441_v49 = vpop.f32.mrf.mxu0  ;;  %1403 = vst [vmem:[%s3056_s25 + $0x68] sm:$0xff] %v1387_v48  ;;  %v1412_v50 = vpack.c.bf16 %v1387_v48, %v1386_v41 }
 0x37f   : > { %1460 = vmatmul.bf16.gmra.mxu0 %v1412_v50 }
 0x382   : > { %v2504_v51 = vpop.eup %2503 }
 0x383   : > { %v1388_v52 = vmul.f32 %v2504_v51, %v3092_v14  ;;  %v1357_v54 = vpop.xlane.xlu1 %1356 }
 0x384   : > { %2505 = vrcp.f32 %v1357_v54 }
 0x385   : > { %1404 = vst [vmem:[%s3056_s25 + $0x70] sm:$0xff] %v1388_v52  ;;  %v1443_v55 = vpop.f32.mrf.mxu0 }
 0x386   : > { %v1473_v53 = vpack.c.bf16 %v1443_v55, %v1441_v49 }
 0x388   : > { %2201 = vmatmul.msk.bf16.gmra.mxu1 %vm1148_vm0, %v1473_v53 }
 0x38a   : > { %v2506_v56 = vpop.eup %2505 }
 0x38b   : > { %v1389_v57 = vmul.f32 %v2506_v56, %v3097_v19 }
 0x38d   : > { %1405 = vst [vmem:[%s3056_s25 + $0x78] sm:$0xff] %v1389_v57  ;;  %v1446_v58 = vpop.f32.mrf.mxu0  ;;  %v1413_v59 = vpack.c.bf16 %v1389_v57, %v1388_v52 }
 0x38f   : > { %1465 = vmatmul.bf16.vlgmr.msra.gmra.mxu2 %v1413_v59 }
 0x395   : > { %v1448_v61 = vpop.f32.mrf.mxu0 }
 0x396   : > { %v1474_v62 = vpack.c.bf16 %v1448_v61, %v1446_v58 }
 0x398   : > { %2202 = vmatmul.msk.bf16.gmra.mxu1 %vm1148_vm0, %v1474_v62 }
 0x3dc   : > { %v1451_v60 = vpop.f32.mrf.mxu0 }
 0x3e4   : > { %v1453_v63 = vpop.f32.mrf.mxu0 }
 0x3e5   : > { %v1475_v0 = vpack.c.bf16 %v1453_v63, %v1451_v60  ;;  %v3124_v1 = vpop.f32.mrf.mxu1 }
 0x3e7   : > { %2203 = vmatmul.msk.bf16.gmra.mxu1 %vm1148_vm0, %v1475_v0 }
 0x3ec   : > { %v1456_v2 = vpop.f32.mrf.mxu0 }
 0x3ed   : > { %v3127_v4 = vpop.f32.mrf.mxu1 }
 0x3f4   : > { %v1458_v5 = vpop.f32.mrf.mxu0 }
 0x3f5   : > { %v1476_v6 = vpack.c.bf16 %v1458_v5, %v1456_v2  ;;  %v3129_v3 = vpop.f32.mrf.mxu1 }
 0x3f7   : > { %2204 = vmatmul.msk.bf16.gmra.mxu1 %vm1148_vm0, %v1476_v6 }
 0x3fc   : > { %v1461_v7 = vpop.f32.mrf.mxu0 }
 0x3fd   : > { %v3132_v8 = vpop.f32.mrf.mxu1 }
 0x404   : > { %v1463_v9 = vpop.f32.mrf.mxu0 }
 0x405   : > { %v1477_v11 = vpack.c.bf16 %v1463_v9, %v1461_v7  ;;  %v3134_v12 = vpop.f32.mrf.mxu1 }
 0x407   : > { %2205 = vmatmul.msk.bf16.gmra.mxu1 %vm1148_vm0, %v1477_v11 }
 0x40d   : > { %v3137_v13 = vpop.f32.mrf.mxu1 }
 0x412   : > { %v1466_v10 = vpop.f32.mrf.mxu2 }
 0x415   : > { %v3139_v14 = vpop.f32.mrf.mxu1 }
 0x41a   : > { %v1468_v15 = vpop.f32.mrf.mxu2 }
 0x41b   : > { %v1478_v16 = vpack.c.bf16 %v1468_v15, %v1466_v10 }
 0x41d   : > { %v3141_v18 = vpop.f32.mrf.mxu1  ;;  %2206 = vmatmul.msk.bf16.gmra.mxu1 %vm1148_vm0, %v1478_v16 }
 0x464   : > { %v3144_v17 = vpop.f32.mrf.mxu1 }
 0x46c   : > { %v3146_v20 = vpop.f32.mrf.mxu1 }
 0x474   : > { %v3148_v19 = vpop.f32.mrf.mxu1 }
 0x47c   : > { %v3150_v22 = vpop.f32.mrf.mxu1 }
 0x484   : > { %v3152_v23 = vpop.f32.mrf.mxu1 }
 0x48c   : > { %v3154_v24 = vpop.f32.mrf.mxu1 }
 0x49a   : > { %v3156_v25 = vpop.f32.mrf.mxu1 }
 0x49e   : > { %1571 = sbr.rel (%p2207_p6) target bundleno = 1206 (0x4b6), region = 60 }
 0x4a2   : > { %v3158_v21 = vpop.f32.mrf.mxu1 }
 0x4a3   : > { %v2507_v27 = vld [vmem:[%s3416_s8] ss:$0 sm:$0xff] }
 0x4a4   : > { %v1576_v29 = vadd.f32 %v2507_v27, %v3124_v1  ;;  %v1577_v26 = vadd.f32 %v2507_v27, %v3127_v4  ;;  %v1578_v30 = vadd.f32 %v2507_v27, %v3129_v3  ;;  %v1579_v28 = vadd.f32 %v2507_v27, %v3132_v8 }
 0x4a5   : > { %v1580_v31 = vadd.f32 %v2507_v27, %v3134_v12  ;;  %v1581_v32 = vadd.f32 %v2507_v27, %v3137_v13  ;;  %v1582_v33 = vadd.f32 %v2507_v27, %v3139_v14  ;;  %v1583_v34 = vadd.f32 %v2507_v27, %v3141_v18 }
 0x4a6   : > { %1592 = vst [vmem:[%s3161_s29] sm:$0xff] %v1576_v29  ;;  %v1584_v35 = vadd.f32 %v2507_v27, %v3144_v17  ;;  %v1585_v36 = vadd.f32 %v2507_v27, %v3146_v20  ;;  %v1586_v37 = vadd.f32 %v2507_v27, %v3148_v19  ;;  %v1587_v39 = vadd.f32 %v2507_v27, %v3150_v22 }
 0x4a7   : > { %1593 = vst [vmem:[%s3161_s29 + $0x8] sm:$0xff] %v1577_v26  ;;  %v1588_v40 = vadd.f32 %v2507_v27, %v3152_v23  ;;  %v1589_v38 = vadd.f32 %v2507_v27, %v3154_v24  ;;  %v1590_v42 = vadd.f32 %v2507_v27, %v3156_v25  ;;  %v1591_v43 = vadd.f32 %v2507_v27, %v3158_v21 }
 0x4a8   : > { %1594 = vst [vmem:[%s3161_s29 + $0x10] sm:$0xff] %v1578_v30 }
 0x4a9   : > { %1595 = vst [vmem:[%s3161_s29 + $0x18] sm:$0xff] %v1579_v28 }
 0x4aa   : > { %1596 = vst [vmem:[%s3161_s29 + $0x20] sm:$0xff] %v1580_v31 }
 0x4ab   : > { %1597 = vst [vmem:[%s3161_s29 + $0x28] sm:$0xff] %v1581_v32 }
 0x4ac   : > { %1598 = vst [vmem:[%s3161_s29 + $0x30] sm:$0xff] %v1582_v33 }
 0x4ad   : > { %1599 = vst [vmem:[%s3161_s29 + $0x38] sm:$0xff] %v1583_v34 }
 0x4ae   : > { %1600 = vst [vmem:[%s3161_s29 + $0x40] sm:$0xff] %v1584_v35 }
 0x4af   : > { %1601 = vst [vmem:[%s3161_s29 + $0x48] sm:$0xff] %v1585_v36 }
 0x4b0   : > { %1602 = vst [vmem:[%s3161_s29 + $0x50] sm:$0xff] %v1586_v37 }
 0x4b1   : > { %1603 = vst [vmem:[%s3161_s29 + $0x58] sm:$0xff] %v1587_v39 }
 0x4b2   : > { %1604 = vst [vmem:[%s3161_s29 + $0x60] sm:$0xff] %v1588_v40 }
 0x4b3   : > { %1605 = vst [vmem:[%s3161_s29 + $0x68] sm:$0xff] %v1589_v38 }
 0x4b4   : > { %1606 = vst [vmem:[%s3161_s29 + $0x70] sm:$0xff] %v1590_v42 }
 0x4b5   : > { %1607 = vst [vmem:[%s3161_s29 + $0x78] sm:$0xff] %v1591_v43 }
 0x4b6 PF: > { %p2208_p8 = scmp.eq.s32.totalorder %s2642_s19, 0 }
 0x4b8   : > { %1611 = sbr.rel (%p2208_p8) target bundleno = 1232 (0x4d0), region = 64 }
 0x4bd   : > { %v1612_v41 = vld [vmem:[%s3161_s29] sm:$0xff]  ;;  %v1613_v44 = vld [vmem:[%s3161_s29 + $0x8] sm:$0xff]  ;;  %v1614_v46 = vld [vmem:[%s3161_s29 + $0x10] sm:$0xff] }
 0x4be   : > { %v1628_v47 = vadd.f32 %v1612_v41, %v3124_v1  ;;  %v1629_v45 = vadd.f32 %v1613_v44, %v3127_v4  ;;  %v1630_v48 = vadd.f32 %v1614_v46, %v3129_v3  ;;  %v1615_v49 = vld [vmem:[%s3161_s29 + $0x18] sm:$0xff]  ;;  %v1616_v50 = vld [vmem:[%s3161_s29 + $0x20] sm:$0xff]  ;;  %v1617_v51 = vld [vmem:[%s3161_s29 + $0x28] sm:$0xff] }
 0x4bf   : > { %v1631_v52 = vadd.f32 %v1615_v49, %v3132_v8  ;;  %v1618_v54 = vld [vmem:[%s3161_s29 + $0x30] sm:$0xff]  ;;  %v1632_v55 = vadd.f32 %v1616_v50, %v3134_v12  ;;  %v1619_v53 = vld [vmem:[%s3161_s29 + $0x38] sm:$0xff]  ;;  %v1633_v56 = vadd.f32 %v1617_v51, %v3137_v13  ;;  %v1620_v57 = vld [vmem:[%s3161_s29 + $0x40] sm:$0xff] }
 0x4c0   : > { %1644 = vst [vmem:[%s3161_s29] sm:$0xff] %v1628_v47  ;;  %v1634_v58 = vadd.f32 %v1618_v54, %v3139_v14  ;;  %v1621_v59 = vld [vmem:[%s3161_s29 + $0x48] sm:$0xff]  ;;  %v1635_v61 = vadd.f32 %v1619_v53, %v3141_v18  ;;  %v1622_v62 = vld [vmem:[%s3161_s29 + $0x50] sm:$0xff]  ;;  %v1636_v60 = vadd.f32 %v1620_v57, %v3144_v17  ;;  %v1623_v63 = vld [vmem:[%s3161_s29 + $0x58] sm:$0xff] }
 0x4c1   : > { %1645 = vst [vmem:[%s3161_s29 + $0x8] sm:$0xff] %v1629_v45  ;;  %v1637_v0 = vadd.f32 %v1621_v59, %v3146_v20  ;;  %v1624_v1 = vld [vmem:[%s3161_s29 + $0x60] sm:$0xff]  ;;  %v1638_v2 = vadd.f32 %v1622_v62, %v3148_v19  ;;  %v1625_v4 = vld [vmem:[%s3161_s29 + $0x68] sm:$0xff]  ;;  %v1639_v5 = vadd.f32 %v1623_v63, %v3150_v22  ;;  %v1626_v6 = vld [vmem:[%s3161_s29 + $0x70] sm:$0xff] }
 0x4c2   : > { %1646 = vst [vmem:[%s3161_s29 + $0x10] sm:$0xff] %v1630_v48  ;;  %v1640_v3 = vadd.f32 %v1624_v1, %v3152_v23  ;;  %v1627_v7 = vld [vmem:[%s3161_s29 + $0x78] sm:$0xff]  ;;  %v1641_v8 = vadd.f32 %v1625_v4, %v3154_v24  ;;  %v1642_v9 = vadd.f32 %v1626_v6, %v3156_v25 }
 0x4c3   : > { %1647 = vst [vmem:[%s3161_s29 + $0x18] sm:$0xff] %v1631_v52  ;;  %v1643_v11 = vadd.f32 %v1627_v7, %v3158_v21 }
 0x4c4   : > { %1648 = vst [vmem:[%s3161_s29 + $0x20] sm:$0xff] %v1632_v55 }
 0x4c5   : > { %1649 = vst [vmem:[%s3161_s29 + $0x28] sm:$0xff] %v1633_v56 }
 0x4c6   : > { %1650 = vst [vmem:[%s3161_s29 + $0x30] sm:$0xff] %v1634_v58 }
 0x4c7   : > { %1651 = vst [vmem:[%s3161_s29 + $0x38] sm:$0xff] %v1635_v61 }
 0x4c8   : > { %1652 = vst [vmem:[%s3161_s29 + $0x40] sm:$0xff] %v1636_v60 }
 0x4c9   : > { %1653 = vst [vmem:[%s3161_s29 + $0x48] sm:$0xff] %v1637_v0 }
 0x4ca   : > { %1654 = vst [vmem:[%s3161_s29 + $0x50] sm:$0xff] %v1638_v2 }
 0x4cb   : > { %1655 = vst [vmem:[%s3161_s29 + $0x58] sm:$0xff] %v1639_v5 }
 0x4cc   : > { %1656 = vst [vmem:[%s3161_s29 + $0x60] sm:$0xff] %v1640_v3 }
 0x4cd   : > { %1657 = vst [vmem:[%s3161_s29 + $0x68] sm:$0xff] %v1641_v8 }
 0x4ce   : > { %1658 = vst [vmem:[%s3161_s29 + $0x70] sm:$0xff] %v1642_v9 }
 0x4cf   : > { %1659 = vst [vmem:[%s3161_s29 + $0x78] sm:$0xff] %v1643_v11 }
 0x4d0 PF: > { %p2209_p9 = scmp.ne.s32.totalorder %s2642_s19, 3 }
 0x4d2   : > { %1663 = sbr.rel (%p2209_p9) target bundleno = 1258 (0x4ea), region = 68 }
 0x4d7   : > { %v1664_v12 = vld [vmem:[%s3161_s29] sm:$0xff]  ;;  %v1665_v13 = vld [vmem:[%s3161_s29 + $0x8] sm:$0xff]  ;;  %v1666_v10 = vld [vmem:[%s3161_s29 + $0x10] sm:$0xff] }
 0x4d8   : > { %v1680_v14 = vmax.f32 %v1664_v12, 0.0  ;;  %v1681_v15 = vmax.f32 %v1665_v13, 0.0  ;;  %v1682_v16 = vmax.f32 %v1666_v10, 0.0  ;;  %v1667_v18 = vld [vmem:[%s3161_s29 + $0x18] sm:$0xff]  ;;  %v1668_v17 = vld [vmem:[%s3161_s29 + $0x20] sm:$0xff]  ;;  %v1669_v20 = vld [vmem:[%s3161_s29 + $0x28] sm:$0xff] }
 0x4d9   : > { %v1683_v19 = vmax.f32 %v1667_v18, 0.0  ;;  %v1670_v22 = vld [vmem:[%s3161_s29 + $0x30] sm:$0xff]  ;;  %v1684_v23 = vmax.f32 %v1668_v17, 0.0  ;;  %v1671_v24 = vld [vmem:[%s3161_s29 + $0x38] sm:$0xff]  ;;  %v1685_v25 = vmax.f32 %v1669_v20, 0.0  ;;  %v1672_v21 = vld [vmem:[%s3161_s29 + $0x40] sm:$0xff] }
 0x4da   : > { %1696 = vst [vmem:[%s3161_s29] sm:$0xff] %v1680_v14  ;;  %v1686_v27 = vmax.f32 %v1670_v22, 0.0  ;;  %v1673_v29 = vld [vmem:[%s3161_s29 + $0x48] sm:$0xff]  ;;  %v1687_v26 = vmax.f32 %v1671_v24, 0.0  ;;  %v1674_v30 = vld [vmem:[%s3161_s29 + $0x50] sm:$0xff]  ;;  %v1688_v28 = vmax.f32 %v1672_v21, 0.0  ;;  %v1675_v31 = vld [vmem:[%s3161_s29 + $0x58] sm:$0xff] }
 0x4db   : > { %1697 = vst [vmem:[%s3161_s29 + $0x8] sm:$0xff] %v1681_v15  ;;  %v1689_v32 = vmax.f32 %v1673_v29, 0.0  ;;  %v1676_v33 = vld [vmem:[%s3161_s29 + $0x60] sm:$0xff]  ;;  %v1690_v34 = vmax.f32 %v1674_v30, 0.0  ;;  %v1677_v35 = vld [vmem:[%s3161_s29 + $0x68] sm:$0xff]  ;;  %v1691_v36 = vmax.f32 %v1675_v31, 0.0 }
 0x4dc   : > { %1698 = vst [vmem:[%s3161_s29 + $0x10] sm:$0xff] %v1682_v16  ;;  %v1678_v37 = vld [vmem:[%s3161_s29 + $0x70] sm:$0xff]  ;;  %v1692_v39 = vmax.f32 %v1676_v33, 0.0  ;;  %v1679_v40 = vld [vmem:[%s3161_s29 + $0x78] sm:$0xff]  ;;  %v1693_v38 = vmax.f32 %v1677_v35, 0.0 }
 0x4dd   : > { %1699 = vst [vmem:[%s3161_s29 + $0x18] sm:$0xff] %v1683_v19  ;;  %v1694_v42 = vmax.f32 %v1678_v37, 0.0  ;;  %v1695_v43 = vmax.f32 %v1679_v40, 0.0 }
 0x4de   : > { %1700 = vst [vmem:[%s3161_s29 + $0x20] sm:$0xff] %v1684_v23 }
 0x4df   : > { %1701 = vst [vmem:[%s3161_s29 + $0x28] sm:$0xff] %v1685_v25 }
 0x4e0   : > { %1702 = vst [vmem:[%s3161_s29 + $0x30] sm:$0xff] %v1686_v27 }
 0x4e1   : > { %1703 = vst [vmem:[%s3161_s29 + $0x38] sm:$0xff] %v1687_v26 }
 0x4e2   : > { %1704 = vst [vmem:[%s3161_s29 + $0x40] sm:$0xff] %v1688_v28 }
 0x4e3   : > { %1705 = vst [vmem:[%s3161_s29 + $0x48] sm:$0xff] %v1689_v32 }
 0x4e4   : > { %1706 = vst [vmem:[%s3161_s29 + $0x50] sm:$0xff] %v1690_v34 }
 0x4e5   : > { %1707 = vst [vmem:[%s3161_s29 + $0x58] sm:$0xff] %v1691_v36 }
 0x4e6   : > { %1708 = vst [vmem:[%s3161_s29 + $0x60] sm:$0xff] %v1692_v39 }
 0x4e7   : > { %1709 = vst [vmem:[%s3161_s29 + $0x68] sm:$0xff] %v1693_v38 }
 0x4e8   : > { %1710 = vst [vmem:[%s3161_s29 + $0x70] sm:$0xff] %v1694_v42 }
 0x4e9   : > { %1711 = vst [vmem:[%s3161_s29 + $0x78] sm:$0xff] %v1695_v43 }
 0x4ea PF: > { %s2276_s27 = sshll.u32 %s2646_s20, 7  ;;  %s3418_s28 = sld [smem:[#allocation25_spill]] }
 0x4eb   : > { %s1732_s24 = sshll.u32 %s3161_s29, 4  ;;  %s3419_s1 = sand.u32 1, %s2634_s17   ;;  %s1733_s24 = int_to_ptr.vmem [resolvable:$true] %s1732_s24 }
 0x4ec   : > { %s1713_s2 = scalar_lea.sflag [#allocation3], %s3419_s1 }
 0x4f0   : > { %s1731_s12 = scalar_lea.hbm %s3418_s28, %s2276_s27  ;;  %s2528_s8 = scalar_lea.hbm %s3418_s28, 256 }
 0x4f1   : > { %s1734_s0 = sshll.u32 %s1731_s12, 4  ;;  %s1735_s0 = int_to_ptr.hbm [resolvable:$true] %s1734_s0 }
 0x4f2   : > { %s2522_s3 = sshra.s32 %s1735_s0, 4  ;;  %s2523_s3 = int_to_ptr.hbm [resolvable:$true] %s2522_s3 }
 0x4f3   : > { %s2524_s4 = scalar_lea.hbm %s2523_s3, 128  ;;  %p2529_p1 = scmp.lt.s32.totalorder %s2523_s3, %s3418_s28 }
 0x4f4   : > { %p2525_p10 = scmp.ne.s32.totalorder %s2523_s3, %s2524_s4  ;;  %p2530_p4 = scmp.lt.s32.totalorder %s2528_s8, %s2524_s4 }
 0x4f6   : > { %p2526_p11 = pnand %p2525_p10, %p2789_p3  ;;  %p2531_p2 = por %p2530_p4, %p2529_p1 }
 0x4f8   : > { %p2527_p0 = pneg %p2526_p11 }
 0x4fa   : > { %p2532_p5 = pnand %p2531_p2, %p2527_p0 }
 0x4fc   : > { %2535 = shalt.err (!%p2532_p5)
}
 0x4fd   : > { %s2660_s1 = smov 128   ;;  %s2661_s29 = smov 8  }
 0x4fe   : > { %2340 = dma.vmem_to_hbm [thread:$0]  (%p2789_p3), %s1733_s24, 2048, %s1735_s0, %s1713_s2, %s2660_s1, %s2660_s1, %s2661_s29  }
 0x4ff   : > { %s2214_s6 = sshll.u32 %s2646_s20, 6  ;;  %s1753_s7 = sshll.u32 %s3056_s25, 4  ;;  %s1754_s7 = int_to_ptr.vmem [resolvable:$true] %s1753_s7 }
 0x500   : > { %s1750_s22 = sadd.s32 %s2642_s19, %s2214_s6  ;;  %s3420_s27 = sld [smem:[#allocation26_spill]] }
 0x501   : > { %s2215_s3 = sshll.u32 %s1750_s22, 3  ;;  %s3421_s5 = sand.u32 1, %s2622_s14  }
 0x502   : > { %s1718_s28 = scalar_lea.sflag [#allocation5], %s3421_s5 }
 0x506   : > { %s1752_s16 = scalar_lea.hbm %s3420_s27, %s2215_s3  ;;  %s2556_s19 = scalar_lea.hbm %s3420_s27, 1024 }
 0x507   : > { %s1755_s12 = sshll.u32 %s1752_s16, 4  ;;  %s1756_s12 = int_to_ptr.hbm [resolvable:$true] %s1755_s12 }
 0x508   : > { %s2550_s26 = sshra.s32 %s1756_s12, 4  ;;  %s2551_s26 = int_to_ptr.hbm [resolvable:$true] %s2550_s26 }
 0x509   : > { %s2552_s18 = scalar_lea.hbm %s2551_s26, 128  ;;  %p2557_p9 = scmp.lt.s32.totalorder %s2551_s26, %s3420_s27 }
 0x50a   : > { %p2553_p6 = scmp.ne.s32.totalorder %s2551_s26, %s2552_s18  ;;  %p2558_p10 = scmp.lt.s32.totalorder %s2556_s19, %s2552_s18 }
 0x50c   : > { %p2554_p8 = pnand %p2553_p6, %p2818_p12  ;;  %p2559_p11 = por %p2558_p10, %p2557_p9 }
 0x50e   : > { %p2555_p3 = pneg %p2554_p8 }
 0x510   : > { %p2560_p0 = pnand %p2559_p11, %p2555_p3 }
 0x512   : > { %2563 = shalt.err (!%p2560_p0)
}
 0x513   : > { %s2662_s25 = smov 512  }
 0x514   : > { %2341 = dma.vmem_to_hbm [thread:$0]  (%p2818_p12), %s1754_s7, 2048, %s1756_s12, %s1718_s28, %s2660_s1, %s2662_s25, %s2661_s29  }
 0x515 PF: > { %s3422_s11 = sld [smem:[#allocation8_spill]]  ;;  %p2351_p1 = scmp.ge.s32.totalorder %s2658_s23, 2 }
 0x517   : > { %p2345_p4 = pnand %p2351_p1, %p2806_p7 }
 0x519   : > { %p2346_p2 = pneg %p2345_p4 }
 0x51b   : > { %s1770_s6 = sand.u32 1, %s3422_s11  }
 0x51c   : > { %s1771_s22 = scalar_lea.sflag [#allocation3], %s1770_s6 }
 0x51d   : > { %2609 = dma.done.wait (%p2346_p2), %s1771_s22, 2048  }
 0x51e   : > { %2611 = vsyncadd (%p2346_p2), %s1771_s22, 4294965248  ;;  %s1780_s18 = sand.u32 1, %s2618_s13   ;;  %p2348_p5 = pnand %p2351_p1, %p2830_p13 }
 0x51f   : > { %s1781_s9 = scalar_lea.sflag [#allocation5], %s1780_s18 }
 0x520   : > { %p2349_p6 = pneg %p2348_p5 }
 0x522   : > { %2613 = dma.done.wait (%p2349_p6), %s1781_s9, 2048  }
 0x523   : > { %2615 = vsyncadd (%p2349_p6), %s1781_s9, 4294965248  ;;  %s27_s23 = sadd.s32 1, %s2658_s23   ;;  %s3423_s10 = sld [smem:[#allocation9_spill]] }
 0x524   : > { %p24_p12 = scmp.ge.s32.totalorder %s27_s23, 10   ;;  %s3424_s18 = sld [smem:[#allocation15_spill]] }
 0x525   : > { %s3425_s19 = sld [smem:[#allocation10_spill]]  ;;  %s3429_s13 = smov %s2622_s14 }
 0x526   : > { %s3426_s20 = sld [smem:[#allocation11_spill]]  ;;  %s3430_s14 = smov %s2626_s15 }
 0x527   : > { %s3427_s26 = sld [smem:[#allocation12_spill]]  ;;  %s3431_s15 = smov %s2826_s21 }
 0x528   : > { %s3428_s22 = sld [smem:[#allocation14_spill]]  ;;  %s3432_s16 = smov %s2634_s17 }
 0x529   : > { %s3433_s17 = smov %s3423_s10  ;;  %26 = sbr.rel (!%p24_p12) target bundleno = 21 (0x15), region = 141 }
 0x52d   : > { %s3434_s21 = smov %s3427_s26 }
 0x52e   :  { %1787 = vsyncpa [#allocation3], 1 }
 0x52f   :  { %1789 = vsyncpa [#allocation3 + $0x1], 1 }
 0x530   :  { %1790 = vsyncpa [#allocation5], 1 }
 0x531   :  { %1792 = vsyncpa [#allocation5 + $0x1], 1 }

</bundles_post_ra>
